<compile_context>
chip_gen: v7x
topology: tpu7x:2x2x1
jax: 0.10.0
libtpu: 0.0.40
codegen_flags: <defaults>
</compile_context>

<pallas_src>
import functools

import jax
import jax.numpy as jnp
from jax.experimental import pallas as pl
from jax.experimental.pallas import tpu as pltpu


def _make_lstm_linear_kernel(num_layers):
    """Build a fully-unrolled stacked-LSTM + Linear-head kernel for `num_layers` layers."""

    def kernel(*refs):
        if num_layers > 1:
            (x_ref, h0_ref, c0_ref, wih0_ref, wihr_ref,
             whh_ref, b_ref, wlin_ref, blin_ref, out_ref) = refs
        else:
            (x_ref, h0_ref, c0_ref, wih0_ref,
             whh_ref, b_ref, wlin_ref, blin_ref, out_ref) = refs
            wihr_ref = None

        L, B, H = h0_ref.shape          # all static
        T = x_ref.shape[0] // B
        OUT_VAR = out_ref.shape[1]
        P = out_ref.shape[0] // B       # pred_len

        def run_layer(layer_in, wih, whh, bias, h, c):
            # layer_in: (T*B, in_dim) time-major slab.
            # Hoisted input projection: one big MXU call + single bias broadcast,
            # both OUTSIDE the serial recurrence.
            gin = (jnp.dot(layer_in.astype(wih.dtype), wih,
                           preferred_element_type=jnp.float32)
                   + bias)                                        # (T*B, 4H), f32
            outs = []
            for t in range(T):                                    # fully unrolled
                g = gin[t * B:(t + 1) * B, :] + jnp.dot(
                    h.astype(whh.dtype), whh,
                    preferred_element_type=jnp.float32)           # (B, 4H)
                # PyTorch gate order: i, f, g, o
                i = jax.nn.sigmoid(g[:, 0 * H:1 * H])
                f = jax.nn.sigmoid(g[:, 1 * H:2 * H])
                gg = jnp.tanh(g[:, 2 * H:3 * H])
                o = jax.nn.sigmoid(g[:, 3 * H:4 * H])
                c = f * c + i * gg
                h = o * jnp.tanh(c)
                outs.append(h)
            return outs

        # ---- layer 0 (input from x) ----
        outs = run_layer(x_ref[...], wih0_ref[...], whh_ref[0], b_ref[0:1, :],
                         h0_ref[0], c0_ref[0])

        # ---- layers 1..L-1 (input from previous layer's hidden sequence) ----
        for l in range(1, L):
            layer_in = jnp.concatenate(outs, axis=0)              # (T*B, H), time-major
            outs = run_layer(layer_in, wihr_ref[l - 1], whh_ref[l],
                             b_ref[l:l + 1, :], h0_ref[l], c0_ref[l])

        # ---- linear head: ONE matmul over the last P hidden states ----
        h_last = jnp.concatenate(outs[T - P:], axis=0)            # (P*B, H)
        pred = (jnp.dot(h_last.astype(wlin_ref.dtype), wlin_ref[...],
                        preferred_element_type=jnp.float32)
                + blin_ref[...])                                  # (P*B, OUT_VAR)
        out_ref[...] = pred.astype(out_ref.dtype)

    return kernel


def lstm_model_forward(x, h0, c0, params, *, pred_len, out_var,
                       compute_dtype=jnp.float32):
    """x: (B, T, F) batch-first (PyTorch convention). Returns (B, pred_len, out_var).

    compute_dtype: jnp.float32 everywhere is safe; jnp.bfloat16 is recommended for the
    matmul operands on v6e / v7x (keep f32 on v5e).
    """
    B, T, F = x.shape
    L, _, H = h0.shape
    assert pred_len <= T and out_var <= pred_len

    # Time-major and flattened so layer-0's input projection is a single (T*B, F) matmul.
    x_tm = jnp.transpose(x, (1, 0, 2)).reshape(T * B, F)

    # Pre-slice the Linear head to the last `out_var` output columns so the kernel never
    # computes (or lane-slices) the pred_len - out_var discarded columns.
    wlin = params["wlin_t"][:, pred_len - out_var:].astype(compute_dtype)   # (H, out_var)
    blin = params["blin"][:, pred_len - out_var:]                           # (1, out_var)

    inputs = [x_tm, h0, c0, params["wih0_t"].astype(compute_dtype)]
    if L > 1:
        inputs.append(params["wihr_t"].astype(compute_dtype))
    inputs += [params["whh_t"].astype(compute_dtype), params["bias"], wlin, blin]

    out_flat = pl.pallas_call(
        _make_lstm_linear_kernel(L),
        out_shape=jax.ShapeDtypeStruct((pred_len * B, out_var), jnp.float32),
        in_specs=[pl.BlockSpec(memory_space=pltpu.MemorySpace.VMEM)] * len(inputs),
        out_specs=pl.BlockSpec(memory_space=pltpu.MemorySpace.VMEM),
        # Everything is VMEM-resident (no tiling); cap is generous headroom even on
        # v7x's smaller 64 MiB VMEM. Scale T/B/H -> chunk the hoisted matmul over T.
        compiler_params=pltpu.CompilerParams(vmem_limit_bytes=32 * 1024 * 1024),
    )(*inputs)

    # (P*B, out_var) time-major -> (B, pred_len, out_var) batch-first
    return jnp.transpose(out_flat.reshape(pred_len, B, out_var), (1, 0, 2))


def init_params(key, n_feats, hidden_size, n_layers, pred_len):
    """Deterministic synthetic parameters with the same shapes PyTorch would create."""
    H = hidden_size
    k = 1.0 / jnp.sqrt(jnp.float32(H))
    keys = jax.random.split(key, 6)

    # layer 0: weight_ih_l0 is (4H, F) in torch; store transposed (F, 4H)
    wih0_t = jax.random.uniform(keys[0], (n_feats, 4 * H), jnp.float32, -k, k)
    # weight_hh_l{k} is (4H, H); store transposed, stacked over layers
    whh_t = jax.random.uniform(keys[2], (n_layers, H, 4 * H), jnp.float32, -k, k)
    # bias_ih + bias_hh combined: (L, 4H)
    bias = (jax.random.uniform(keys[3], (n_layers, 4 * H), jnp.float32, -k, k)
            + jax.random.uniform(keys[4], (n_layers, 4 * H), jnp.float32, -k, k))
    # Linear(hidden_size, pred_len): weight (pred_len, H) in torch; store transposed
    wlin_t = jax.random.uniform(keys[5], (H, pred_len), jnp.float32, -k, k)
    blin = jnp.zeros((1, pred_len), jnp.float32)

    params = {"wih0_t": wih0_t, "whh_t": whh_t, "bias": bias,
              "wlin_t": wlin_t, "blin": blin}
    if n_layers > 1:
        # layers 1..L-1: weight_ih_l{k} is (4H, H); store transposed, stacked
        params["wihr_t"] = jax.random.uniform(
            keys[1], (n_layers - 1, H, 4 * H), jnp.float32, -k, k)
    return params


if __name__ == "__main__":
    # Small config consistent with the module's args:
    # n_feats=4, hidden_size=32, n_layers=2, pred_len=4, out_var=2, batch=2, seq_len=8
    n_feats, hidden_size, n_layers = 4, 32, 2
    pred_len, out_var = 4, 2
    batch, seq_len = 2, 8

    key = jax.random.PRNGKey(0)
    k_x, k_h, k_c, k_p = jax.random.split(key, 4)

    x = jax.random.normal(k_x, (batch, seq_len, n_feats), jnp.float32)
    # torch.randn h_0 / c_0 in forward -> deterministic random init here
    h0 = jax.random.normal(k_h, (n_layers, batch, hidden_size), jnp.float32)
    c0 = jax.random.normal(k_c, (n_layers, batch, hidden_size), jnp.float32)
    params = init_params(k_p, n_feats, hidden_size, n_layers, pred_len)

    fwd = jax.jit(functools.partial(lstm_model_forward,
                                    pred_len=pred_len, out_var=out_var))
    pred = fwd(x, h0, c0, params)
    jax.block_until_ready(pred)

    assert pred.shape == (batch, pred_len, out_var), pred.shape
    assert jnp.all(jnp.isfinite(pred))
    print("KERNEL_OK")
</pallas_src>

<mosaic_0001>
module attributes {stable_mosaic.version = 11 : i64} {
  func.func @kernel(%arg0: memref<16x4xf32, #tpu.memory_space<vmem>>, %arg1: memref<2x2x32xf32, #tpu.memory_space<vmem>>, %arg2: memref<2x2x32xf32, #tpu.memory_space<vmem>>, %arg3: memref<4x128xf32, #tpu.memory_space<vmem>>, %arg4: memref<1x32x128xf32, #tpu.memory_space<vmem>>, %arg5: memref<2x32x128xf32, #tpu.memory_space<vmem>>, %arg6: memref<2x128xf32, #tpu.memory_space<vmem>>, %arg7: memref<32x2xf32, #tpu.memory_space<vmem>>, %arg8: memref<1x2xf32, #tpu.memory_space<vmem>>, %arg9: memref<8x2xf32, #tpu.memory_space<vmem>>) attributes {dimension_semantics = [], scalar_prefetch = 0 : i64, scratch_operands = 0 : i64, tpu.core_type = #tpu.core_type<tc>} {
    %c0 = arith.constant 0 : index
    %c0_0 = arith.constant 0 : index
    %0 = vector.load %arg0[%c0, %c0_0] : memref<16x4xf32, #tpu.memory_space<vmem>>, vector<16x4xf32>
    %c0_1 = arith.constant 0 : index
    %c0_2 = arith.constant 0 : index
    %1 = vector.load %arg3[%c0_1, %c0_2] : memref<4x128xf32, #tpu.memory_space<vmem>>, vector<4x128xf32>
    %c0_3 = arith.constant 0 : index
    %c0_4 = arith.constant 0 : index
    %c0_5 = arith.constant 0 : index
    %2 = vector.load %arg5[%c0_3, %c0_4, %c0_5] : memref<2x32x128xf32, #tpu.memory_space<vmem>>, vector<1x32x128xf32>
    %3 = vector.shape_cast %2 : vector<1x32x128xf32> to vector<32x128xf32>
    %c0_6 = arith.constant 0 : index
    %c0_7 = arith.constant 0 : index
    %4 = vector.load %arg6[%c0_6, %c0_7] : memref<2x128xf32, #tpu.memory_space<vmem>>, vector<1x128xf32>
    %c0_8 = arith.constant 0 : index
    %c0_9 = arith.constant 0 : index
    %c0_10 = arith.constant 0 : index
    %5 = vector.load %arg1[%c0_8, %c0_9, %c0_10] : memref<2x2x32xf32, #tpu.memory_space<vmem>>, vector<1x2x32xf32>
    %6 = vector.shape_cast %5 : vector<1x2x32xf32> to vector<2x32xf32>
    %c0_11 = arith.constant 0 : index
    %c0_12 = arith.constant 0 : index
    %c0_13 = arith.constant 0 : index
    %7 = vector.load %arg2[%c0_11, %c0_12, %c0_13] : memref<2x2x32xf32, #tpu.memory_space<vmem>>, vector<1x2x32xf32>
    %8 = vector.shape_cast %7 : vector<1x2x32xf32> to vector<2x32xf32>
    %cst = arith.constant dense<0.000000e+00> : vector<16x128xf32>
    %9 = tpu.matmul %0, %1, %cst {dimension_numbers = #tpu.dot_dimension_numbers<[1], [0], [0], [1], [0, 0, 1, 1], [], []>} : vector<16x4xf32>, vector<4x128xf32>, vector<16x128xf32> -> vector<16x128xf32>
    %10 = vector.broadcast %4 : vector<1x128xf32> to vector<16x128xf32>
    %11 = arith.addf %9, %10 : vector<16x128xf32>
    %12 = vector.extract_strided_slice %11 {offsets = [0, 0], sizes = [2, 128], strides = [1, 1]} : vector<16x128xf32> to vector<2x128xf32>
    %cst_14 = arith.constant dense<0.000000e+00> : vector<2x128xf32>
    %13 = tpu.matmul %6, %3, %cst_14 {dimension_numbers = #tpu.dot_dimension_numbers<[1], [0], [0], [1], [0, 0, 1, 1], [], []>} : vector<2x32xf32>, vector<32x128xf32>, vector<2x128xf32> -> vector<2x128xf32>
    %14 = arith.addf %12, %13 : vector<2x128xf32>
    %15 = vector.extract_strided_slice %14 {offsets = [0, 0], sizes = [2, 32], strides = [1, 1]} : vector<2x128xf32> to vector<2x32xf32>
    %16 = arith.negf %15 : vector<2x32xf32>
    %17 = math.exp %16 : vector<2x32xf32>
    %cst_15 = arith.constant 1.000000e+00 : f32
    %18 = vector.broadcast %cst_15 : f32 to vector<2x32xf32>
    %19 = arith.addf %18, %17 : vector<2x32xf32>
    %20 = arith.divf %18, %19 : vector<2x32xf32>
    %21 = vector.extract_strided_slice %14 {offsets = [0, 32], sizes = [2, 32], strides = [1, 1]} : vector<2x128xf32> to vector<2x32xf32>
    %22 = arith.negf %21 : vector<2x32xf32>
    %23 = math.exp %22 : vector<2x32xf32>
    %cst_16 = arith.constant 1.000000e+00 : f32
    %24 = vector.broadcast %cst_16 : f32 to vector<2x32xf32>
    %25 = arith.addf %24, %23 : vector<2x32xf32>
    %26 = arith.divf %24, %25 : vector<2x32xf32>
    %27 = vector.extract_strided_slice %14 {offsets = [0, 64], sizes = [2, 32], strides = [1, 1]} : vector<2x128xf32> to vector<2x32xf32>
    %28 = math.tanh %27 : vector<2x32xf32>
    %29 = vector.extract_strided_slice %14 {offsets = [0, 96], sizes = [2, 32], strides = [1, 1]} : vector<2x128xf32> to vector<2x32xf32>
    %30 = arith.negf %29 : vector<2x32xf32>
    %31 = math.exp %30 : vector<2x32xf32>
    %cst_17 = arith.constant 1.000000e+00 : f32
    %32 = vector.broadcast %cst_17 : f32 to vector<2x32xf32>
    %33 = arith.addf %32, %31 : vector<2x32xf32>
    %34 = arith.divf %32, %33 : vector<2x32xf32>
    %35 = arith.mulf %26, %8 : vector<2x32xf32>
    %36 = arith.mulf %20, %28 : vector<2x32xf32>
    %37 = arith.addf %35, %36 : vector<2x32xf32>
    %38 = math.tanh %37 : vector<2x32xf32>
    %39 = arith.mulf %34, %38 : vector<2x32xf32>
    %40 = vector.extract_strided_slice %11 {offsets = [2, 0], sizes = [2, 128], strides = [1, 1]} : vector<16x128xf32> to vector<2x128xf32>
    %cst_18 = arith.constant dense<0.000000e+00> : vector<2x128xf32>
    %41 = tpu.matmul %39, %3, %cst_18 {dimension_numbers = #tpu.dot_dimension_numbers<[1], [0], [0], [1], [0, 0, 1, 1], [], []>} : vector<2x32xf32>, vector<32x128xf32>, vector<2x128xf32> -> vector<2x128xf32>
    %42 = arith.addf %40, %41 : vector<2x128xf32>
    %43 = vector.extract_strided_slice %42 {offsets = [0, 0], sizes = [2, 32], strides = [1, 1]} : vector<2x128xf32> to vector<2x32xf32>
    %44 = arith.negf %43 : vector<2x32xf32>
    %45 = math.exp %44 : vector<2x32xf32>
    %cst_19 = arith.constant 1.000000e+00 : f32
    %46 = vector.broadcast %cst_19 : f32 to vector<2x32xf32>
    %47 = arith.addf %46, %45 : vector<2x32xf32>
    %48 = arith.divf %46, %47 : vector<2x32xf32>
    %49 = vector.extract_strided_slice %42 {offsets = [0, 32], sizes = [2, 32], strides = [1, 1]} : vector<2x128xf32> to vector<2x32xf32>
    %50 = arith.negf %49 : vector<2x32xf32>
    %51 = math.exp %50 : vector<2x32xf32>
    %cst_20 = arith.constant 1.000000e+00 : f32
    %52 = vector.broadcast %cst_20 : f32 to vector<2x32xf32>
    %53 = arith.addf %52, %51 : vector<2x32xf32>
    %54 = arith.divf %52, %53 : vector<2x32xf32>
    %55 = vector.extract_strided_slice %42 {offsets = [0, 64], sizes = [2, 32], strides = [1, 1]} : vector<2x128xf32> to vector<2x32xf32>
    %56 = math.tanh %55 : vector<2x32xf32>
    %57 = vector.extract_strided_slice %42 {offsets = [0, 96], sizes = [2, 32], strides = [1, 1]} : vector<2x128xf32> to vector<2x32xf32>
    %58 = arith.negf %57 : vector<2x32xf32>
    %59 = math.exp %58 : vector<2x32xf32>
    %cst_21 = arith.constant 1.000000e+00 : f32
    %60 = vector.broadcast %cst_21 : f32 to vector<2x32xf32>
    %61 = arith.addf %60, %59 : vector<2x32xf32>
    %62 = arith.divf %60, %61 : vector<2x32xf32>
    %63 = arith.mulf %54, %37 : vector<2x32xf32>
    %64 = arith.mulf %48, %56 : vector<2x32xf32>
    %65 = arith.addf %63, %64 : vector<2x32xf32>
    %66 = math.tanh %65 : vector<2x32xf32>
    %67 = arith.mulf %62, %66 : vector<2x32xf32>
    %68 = vector.extract_strided_slice %11 {offsets = [4, 0], sizes = [2, 128], strides = [1, 1]} : vector<16x128xf32> to vector<2x128xf32>
    %cst_22 = arith.constant dense<0.000000e+00> : vector<2x128xf32>
    %69 = tpu.matmul %67, %3, %cst_22 {dimension_numbers = #tpu.dot_dimension_numbers<[1], [0], [0], [1], [0, 0, 1, 1], [], []>} : vector<2x32xf32>, vector<32x128xf32>, vector<2x128xf32> -> vector<2x128xf32>
    %70 = arith.addf %68, %69 : vector<2x128xf32>
    %71 = vector.extract_strided_slice %70 {offsets = [0, 0], sizes = [2, 32], strides = [1, 1]} : vector<2x128xf32> to vector<2x32xf32>
    %72 = arith.negf %71 : vector<2x32xf32>
    %73 = math.exp %72 : vector<2x32xf32>
    %cst_23 = arith.constant 1.000000e+00 : f32
    %74 = vector.broadcast %cst_23 : f32 to vector<2x32xf32>
    %75 = arith.addf %74, %73 : vector<2x32xf32>
    %76 = arith.divf %74, %75 : vector<2x32xf32>
    %77 = vector.extract_strided_slice %70 {offsets = [0, 32], sizes = [2, 32], strides = [1, 1]} : vector<2x128xf32> to vector<2x32xf32>
    %78 = arith.negf %77 : vector<2x32xf32>
    %79 = math.exp %78 : vector<2x32xf32>
    %cst_24 = arith.constant 1.000000e+00 : f32
    %80 = vector.broadcast %cst_24 : f32 to vector<2x32xf32>
    %81 = arith.addf %80, %79 : vector<2x32xf32>
    %82 = arith.divf %80, %81 : vector<2x32xf32>
    %83 = vector.extract_strided_slice %70 {offsets = [0, 64], sizes = [2, 32], strides = [1, 1]} : vector<2x128xf32> to vector<2x32xf32>
    %84 = math.tanh %83 : vector<2x32xf32>
    %85 = vector.extract_strided_slice %70 {offsets = [0, 96], sizes = [2, 32], strides = [1, 1]} : vector<2x128xf32> to vector<2x32xf32>
    %86 = arith.negf %85 : vector<2x32xf32>
    %87 = math.exp %86 : vector<2x32xf32>
    %cst_25 = arith.constant 1.000000e+00 : f32
    %88 = vector.broadcast %cst_25 : f32 to vector<2x32xf32>
    %89 = arith.addf %88, %87 : vector<2x32xf32>
    %90 = arith.divf %88, %89 : vector<2x32xf32>
    %91 = arith.mulf %82, %65 : vector<2x32xf32>
    %92 = arith.mulf %76, %84 : vector<2x32xf32>
    %93 = arith.addf %91, %92 : vector<2x32xf32>
    %94 = math.tanh %93 : vector<2x32xf32>
    %95 = arith.mulf %90, %94 : vector<2x32xf32>
    %96 = vector.extract_strided_slice %11 {offsets = [6, 0], sizes = [2, 128], strides = [1, 1]} : vector<16x128xf32> to vector<2x128xf32>
    %cst_26 = arith.constant dense<0.000000e+00> : vector<2x128xf32>
    %97 = tpu.matmul %95, %3, %cst_26 {dimension_numbers = #tpu.dot_dimension_numbers<[1], [0], [0], [1], [0, 0, 1, 1], [], []>} : vector<2x32xf32>, vector<32x128xf32>, vector<2x128xf32> -> vector<2x128xf32>
    %98 = arith.addf %96, %97 : vector<2x128xf32>
    %99 = vector.extract_strided_slice %98 {offsets = [0, 0], sizes = [2, 32], strides = [1, 1]} : vector<2x128xf32> to vector<2x32xf32>
    %100 = arith.negf %99 : vector<2x32xf32>
    %101 = math.exp %100 : vector<2x32xf32>
    %cst_27 = arith.constant 1.000000e+00 : f32
    %102 = vector.broadcast %cst_27 : f32 to vector<2x32xf32>
    %103 = arith.addf %102, %101 : vector<2x32xf32>
    %104 = arith.divf %102, %103 : vector<2x32xf32>
    %105 = vector.extract_strided_slice %98 {offsets = [0, 32], sizes = [2, 32], strides = [1, 1]} : vector<2x128xf32> to vector<2x32xf32>
    %106 = arith.negf %105 : vector<2x32xf32>
    %107 = math.exp %106 : vector<2x32xf32>
    %cst_28 = arith.constant 1.000000e+00 : f32
    %108 = vector.broadcast %cst_28 : f32 to vector<2x32xf32>
    %109 = arith.addf %108, %107 : vector<2x32xf32>
    %110 = arith.divf %108, %109 : vector<2x32xf32>
    %111 = vector.extract_strided_slice %98 {offsets = [0, 64], sizes = [2, 32], strides = [1, 1]} : vector<2x128xf32> to vector<2x32xf32>
    %112 = math.tanh %111 : vector<2x32xf32>
    %113 = vector.extract_strided_slice %98 {offsets = [0, 96], sizes = [2, 32], strides = [1, 1]} : vector<2x128xf32> to vector<2x32xf32>
    %114 = arith.negf %113 : vector<2x32xf32>
    %115 = math.exp %114 : vector<2x32xf32>
    %cst_29 = arith.constant 1.000000e+00 : f32
    %116 = vector.broadcast %cst_29 : f32 to vector<2x32xf32>
    %117 = arith.addf %116, %115 : vector<2x32xf32>
    %118 = arith.divf %116, %117 : vector<2x32xf32>
    %119 = arith.mulf %110, %93 : vector<2x32xf32>
    %120 = arith.mulf %104, %112 : vector<2x32xf32>
    %121 = arith.addf %119, %120 : vector<2x32xf32>
    %122 = math.tanh %121 : vector<2x32xf32>
    %123 = arith.mulf %118, %122 : vector<2x32xf32>
    %124 = vector.extract_strided_slice %11 {offsets = [8, 0], sizes = [2, 128], strides = [1, 1]} : vector<16x128xf32> to vector<2x128xf32>
    %cst_30 = arith.constant dense<0.000000e+00> : vector<2x128xf32>
    %125 = tpu.matmul %123, %3, %cst_30 {dimension_numbers = #tpu.dot_dimension_numbers<[1], [0], [0], [1], [0, 0, 1, 1], [], []>} : vector<2x32xf32>, vector<32x128xf32>, vector<2x128xf32> -> vector<2x128xf32>
    %126 = arith.addf %124, %125 : vector<2x128xf32>
    %127 = vector.extract_strided_slice %126 {offsets = [0, 0], sizes = [2, 32], strides = [1, 1]} : vector<2x128xf32> to vector<2x32xf32>
    %128 = arith.negf %127 : vector<2x32xf32>
    %129 = math.exp %128 : vector<2x32xf32>
    %cst_31 = arith.constant 1.000000e+00 : f32
    %130 = vector.broadcast %cst_31 : f32 to vector<2x32xf32>
    %131 = arith.addf %130, %129 : vector<2x32xf32>
    %132 = arith.divf %130, %131 : vector<2x32xf32>
    %133 = vector.extract_strided_slice %126 {offsets = [0, 32], sizes = [2, 32], strides = [1, 1]} : vector<2x128xf32> to vector<2x32xf32>
    %134 = arith.negf %133 : vector<2x32xf32>
    %135 = math.exp %134 : vector<2x32xf32>
    %cst_32 = arith.constant 1.000000e+00 : f32
    %136 = vector.broadcast %cst_32 : f32 to vector<2x32xf32>
    %137 = arith.addf %136, %135 : vector<2x32xf32>
    %138 = arith.divf %136, %137 : vector<2x32xf32>
    %139 = vector.extract_strided_slice %126 {offsets = [0, 64], sizes = [2, 32], strides = [1, 1]} : vector<2x128xf32> to vector<2x32xf32>
    %140 = math.tanh %139 : vector<2x32xf32>
    %141 = vector.extract_strided_slice %126 {offsets = [0, 96], sizes = [2, 32], strides = [1, 1]} : vector<2x128xf32> to vector<2x32xf32>
    %142 = arith.negf %141 : vector<2x32xf32>
    %143 = math.exp %142 : vector<2x32xf32>
    %cst_33 = arith.constant 1.000000e+00 : f32
    %144 = vector.broadcast %cst_33 : f32 to vector<2x32xf32>
    %145 = arith.addf %144, %143 : vector<2x32xf32>
    %146 = arith.divf %144, %145 : vector<2x32xf32>
    %147 = arith.mulf %138, %121 : vector<2x32xf32>
    %148 = arith.mulf %132, %140 : vector<2x32xf32>
    %149 = arith.addf %147, %148 : vector<2x32xf32>
    %150 = math.tanh %149 : vector<2x32xf32>
    %151 = arith.mulf %146, %150 : vector<2x32xf32>
    %152 = vector.extract_strided_slice %11 {offsets = [10, 0], sizes = [2, 128], strides = [1, 1]} : vector<16x128xf32> to vector<2x128xf32>
    %cst_34 = arith.constant dense<0.000000e+00> : vector<2x128xf32>
    %153 = tpu.matmul %151, %3, %cst_34 {dimension_numbers = #tpu.dot_dimension_numbers<[1], [0], [0], [1], [0, 0, 1, 1], [], []>} : vector<2x32xf32>, vector<32x128xf32>, vector<2x128xf32> -> vector<2x128xf32>
    %154 = arith.addf %152, %153 : vector<2x128xf32>
    %155 = vector.extract_strided_slice %154 {offsets = [0, 0], sizes = [2, 32], strides = [1, 1]} : vector<2x128xf32> to vector<2x32xf32>
    %156 = arith.negf %155 : vector<2x32xf32>
    %157 = math.exp %156 : vector<2x32xf32>
    %cst_35 = arith.constant 1.000000e+00 : f32
    %158 = vector.broadcast %cst_35 : f32 to vector<2x32xf32>
    %159 = arith.addf %158, %157 : vector<2x32xf32>
    %160 = arith.divf %158, %159 : vector<2x32xf32>
    %161 = vector.extract_strided_slice %154 {offsets = [0, 32], sizes = [2, 32], strides = [1, 1]} : vector<2x128xf32> to vector<2x32xf32>
    %162 = arith.negf %161 : vector<2x32xf32>
    %163 = math.exp %162 : vector<2x32xf32>
    %cst_36 = arith.constant 1.000000e+00 : f32
    %164 = vector.broadcast %cst_36 : f32 to vector<2x32xf32>
    %165 = arith.addf %164, %163 : vector<2x32xf32>
    %166 = arith.divf %164, %165 : vector<2x32xf32>
    %167 = vector.extract_strided_slice %154 {offsets = [0, 64], sizes = [2, 32], strides = [1, 1]} : vector<2x128xf32> to vector<2x32xf32>
    %168 = math.tanh %167 : vector<2x32xf32>
    %169 = vector.extract_strided_slice %154 {offsets = [0, 96], sizes = [2, 32], strides = [1, 1]} : vector<2x128xf32> to vector<2x32xf32>
    %170 = arith.negf %169 : vector<2x32xf32>
    %171 = math.exp %170 : vector<2x32xf32>
    %cst_37 = arith.constant 1.000000e+00 : f32
    %172 = vector.broadcast %cst_37 : f32 to vector<2x32xf32>
    %173 = arith.addf %172, %171 : vector<2x32xf32>
    %174 = arith.divf %172, %173 : vector<2x32xf32>
    %175 = arith.mulf %166, %149 : vector<2x32xf32>
    %176 = arith.mulf %160, %168 : vector<2x32xf32>
    %177 = arith.addf %175, %176 : vector<2x32xf32>
    %178 = math.tanh %177 : vector<2x32xf32>
    %179 = arith.mulf %174, %178 : vector<2x32xf32>
    %180 = vector.extract_strided_slice %11 {offsets = [12, 0], sizes = [2, 128], strides = [1, 1]} : vector<16x128xf32> to vector<2x128xf32>
    %cst_38 = arith.constant dense<0.000000e+00> : vector<2x128xf32>
    %181 = tpu.matmul %179, %3, %cst_38 {dimension_numbers = #tpu.dot_dimension_numbers<[1], [0], [0], [1], [0, 0, 1, 1], [], []>} : vector<2x32xf32>, vector<32x128xf32>, vector<2x128xf32> -> vector<2x128xf32>
    %182 = arith.addf %180, %181 : vector<2x128xf32>
    %183 = vector.extract_strided_slice %182 {offsets = [0, 0], sizes = [2, 32], strides = [1, 1]} : vector<2x128xf32> to vector<2x32xf32>
    %184 = arith.negf %183 : vector<2x32xf32>
    %185 = math.exp %184 : vector<2x32xf32>
    %cst_39 = arith.constant 1.000000e+00 : f32
    %186 = vector.broadcast %cst_39 : f32 to vector<2x32xf32>
    %187 = arith.addf %186, %185 : vector<2x32xf32>
    %188 = arith.divf %186, %187 : vector<2x32xf32>
    %189 = vector.extract_strided_slice %182 {offsets = [0, 32], sizes = [2, 32], strides = [1, 1]} : vector<2x128xf32> to vector<2x32xf32>
    %190 = arith.negf %189 : vector<2x32xf32>
    %191 = math.exp %190 : vector<2x32xf32>
    %cst_40 = arith.constant 1.000000e+00 : f32
    %192 = vector.broadcast %cst_40 : f32 to vector<2x32xf32>
    %193 = arith.addf %192, %191 : vector<2x32xf32>
    %194 = arith.divf %192, %193 : vector<2x32xf32>
    %195 = vector.extract_strided_slice %182 {offsets = [0, 64], sizes = [2, 32], strides = [1, 1]} : vector<2x128xf32> to vector<2x32xf32>
    %196 = math.tanh %195 : vector<2x32xf32>
    %197 = vector.extract_strided_slice %182 {offsets = [0, 96], sizes = [2, 32], strides = [1, 1]} : vector<2x128xf32> to vector<2x32xf32>
    %198 = arith.negf %197 : vector<2x32xf32>
    %199 = math.exp %198 : vector<2x32xf32>
    %cst_41 = arith.constant 1.000000e+00 : f32
    %200 = vector.broadcast %cst_41 : f32 to vector<2x32xf32>
    %201 = arith.addf %200, %199 : vector<2x32xf32>
    %202 = arith.divf %200, %201 : vector<2x32xf32>
    %203 = arith.mulf %194, %177 : vector<2x32xf32>
    %204 = arith.mulf %188, %196 : vector<2x32xf32>
    %205 = arith.addf %203, %204 : vector<2x32xf32>
    %206 = math.tanh %205 : vector<2x32xf32>
    %207 = arith.mulf %202, %206 : vector<2x32xf32>
    %208 = vector.extract_strided_slice %11 {offsets = [14, 0], sizes = [2, 128], strides = [1, 1]} : vector<16x128xf32> to vector<2x128xf32>
    %cst_42 = arith.constant dense<0.000000e+00> : vector<2x128xf32>
    %209 = tpu.matmul %207, %3, %cst_42 {dimension_numbers = #tpu.dot_dimension_numbers<[1], [0], [0], [1], [0, 0, 1, 1], [], []>} : vector<2x32xf32>, vector<32x128xf32>, vector<2x128xf32> -> vector<2x128xf32>
    %210 = arith.addf %208, %209 : vector<2x128xf32>
    %211 = vector.extract_strided_slice %210 {offsets = [0, 0], sizes = [2, 32], strides = [1, 1]} : vector<2x128xf32> to vector<2x32xf32>
    %212 = arith.negf %211 : vector<2x32xf32>
    %213 = math.exp %212 : vector<2x32xf32>
    %cst_43 = arith.constant 1.000000e+00 : f32
    %214 = vector.broadcast %cst_43 : f32 to vector<2x32xf32>
    %215 = arith.addf %214, %213 : vector<2x32xf32>
    %216 = arith.divf %214, %215 : vector<2x32xf32>
    %217 = vector.extract_strided_slice %210 {offsets = [0, 32], sizes = [2, 32], strides = [1, 1]} : vector<2x128xf32> to vector<2x32xf32>
    %218 = arith.negf %217 : vector<2x32xf32>
    %219 = math.exp %218 : vector<2x32xf32>
    %cst_44 = arith.constant 1.000000e+00 : f32
    %220 = vector.broadcast %cst_44 : f32 to vector<2x32xf32>
    %221 = arith.addf %220, %219 : vector<2x32xf32>
    %222 = arith.divf %220, %221 : vector<2x32xf32>
    %223 = vector.extract_strided_slice %210 {offsets = [0, 64], sizes = [2, 32], strides = [1, 1]} : vector<2x128xf32> to vector<2x32xf32>
    %224 = math.tanh %223 : vector<2x32xf32>
    %225 = vector.extract_strided_slice %210 {offsets = [0, 96], sizes = [2, 32], strides = [1, 1]} : vector<2x128xf32> to vector<2x32xf32>
    %226 = arith.negf %225 : vector<2x32xf32>
    %227 = math.exp %226 : vector<2x32xf32>
    %cst_45 = arith.constant 1.000000e+00 : f32
    %228 = vector.broadcast %cst_45 : f32 to vector<2x32xf32>
    %229 = arith.addf %228, %227 : vector<2x32xf32>
    %230 = arith.divf %228, %229 : vector<2x32xf32>
    %231 = arith.mulf %222, %205 : vector<2x32xf32>
    %232 = arith.mulf %216, %224 : vector<2x32xf32>
    %233 = arith.addf %231, %232 : vector<2x32xf32>
    %234 = math.tanh %233 : vector<2x32xf32>
    %235 = arith.mulf %230, %234 : vector<2x32xf32>
    %236 = tpu.concatenate %39, %67, %95, %123, %151, %179, %207, %235 in 0 : vector<2x32xf32>, vector<2x32xf32>, vector<2x32xf32>, vector<2x32xf32>, vector<2x32xf32>, vector<2x32xf32>, vector<2x32xf32>, vector<2x32xf32> -> vector<16x32xf32>
    %c0_46 = arith.constant 0 : index
    %c0_47 = arith.constant 0 : index
    %c0_48 = arith.constant 0 : index
    %237 = vector.load %arg4[%c0_46, %c0_47, %c0_48] : memref<1x32x128xf32, #tpu.memory_space<vmem>>, vector<1x32x128xf32>
    %238 = vector.shape_cast %237 : vector<1x32x128xf32> to vector<32x128xf32>
    %c1 = arith.constant 1 : index
    %c0_49 = arith.constant 0 : index
    %c0_50 = arith.constant 0 : index
    %239 = vector.load %arg5[%c1, %c0_49, %c0_50] : memref<2x32x128xf32, #tpu.memory_space<vmem>>, vector<1x32x128xf32>
    %240 = vector.shape_cast %239 : vector<1x32x128xf32> to vector<32x128xf32>
    %c1_51 = arith.constant 1 : index
    %c0_52 = arith.constant 0 : index
    %241 = vector.load %arg6[%c1_51, %c0_52] : memref<2x128xf32, #tpu.memory_space<vmem>>, vector<1x128xf32>
    %c1_53 = arith.constant 1 : index
    %c0_54 = arith.constant 0 : index
    %c0_55 = arith.constant 0 : index
    %242 = vector.load %arg1[%c1_53, %c0_54, %c0_55] : memref<2x2x32xf32, #tpu.memory_space<vmem>>, vector<1x2x32xf32>
    %243 = vector.shape_cast %242 : vector<1x2x32xf32> to vector<2x32xf32>
    %c1_56 = arith.constant 1 : index
    %c0_57 = arith.constant 0 : index
    %c0_58 = arith.constant 0 : index
    %244 = vector.load %arg2[%c1_56, %c0_57, %c0_58] : memref<2x2x32xf32, #tpu.memory_space<vmem>>, vector<1x2x32xf32>
    %245 = vector.shape_cast %244 : vector<1x2x32xf32> to vector<2x32xf32>
    %cst_59 = arith.constant dense<0.000000e+00> : vector<16x128xf32>
    %246 = tpu.matmul %236, %238, %cst_59 {dimension_numbers = #tpu.dot_dimension_numbers<[1], [0], [0], [1], [0, 0, 1, 1], [], []>} : vector<16x32xf32>, vector<32x128xf32>, vector<16x128xf32> -> vector<16x128xf32>
    %247 = vector.broadcast %241 : vector<1x128xf32> to vector<16x128xf32>
    %248 = arith.addf %246, %247 : vector<16x128xf32>
    %249 = vector.extract_strided_slice %248 {offsets = [0, 0], sizes = [2, 128], strides = [1, 1]} : vector<16x128xf32> to vector<2x128xf32>
    %cst_60 = arith.constant dense<0.000000e+00> : vector<2x128xf32>
    %250 = tpu.matmul %243, %240, %cst_60 {dimension_numbers = #tpu.dot_dimension_numbers<[1], [0], [0], [1], [0, 0, 1, 1], [], []>} : vector<2x32xf32>, vector<32x128xf32>, vector<2x128xf32> -> vector<2x128xf32>
    %251 = arith.addf %249, %250 : vector<2x128xf32>
    %252 = vector.extract_strided_slice %251 {offsets = [0, 0], sizes = [2, 32], strides = [1, 1]} : vector<2x128xf32> to vector<2x32xf32>
    %253 = arith.negf %252 : vector<2x32xf32>
    %254 = math.exp %253 : vector<2x32xf32>
    %cst_61 = arith.constant 1.000000e+00 : f32
    %255 = vector.broadcast %cst_61 : f32 to vector<2x32xf32>
    %256 = arith.addf %255, %254 : vector<2x32xf32>
    %257 = arith.divf %255, %256 : vector<2x32xf32>
    %258 = vector.extract_strided_slice %251 {offsets = [0, 32], sizes = [2, 32], strides = [1, 1]} : vector<2x128xf32> to vector<2x32xf32>
    %259 = arith.negf %258 : vector<2x32xf32>
    %260 = math.exp %259 : vector<2x32xf32>
    %cst_62 = arith.constant 1.000000e+00 : f32
    %261 = vector.broadcast %cst_62 : f32 to vector<2x32xf32>
    %262 = arith.addf %261, %260 : vector<2x32xf32>
    %263 = arith.divf %261, %262 : vector<2x32xf32>
    %264 = vector.extract_strided_slice %251 {offsets = [0, 64], sizes = [2, 32], strides = [1, 1]} : vector<2x128xf32> to vector<2x32xf32>
    %265 = math.tanh %264 : vector<2x32xf32>
    %266 = vector.extract_strided_slice %251 {offsets = [0, 96], sizes = [2, 32], strides = [1, 1]} : vector<2x128xf32> to vector<2x32xf32>
    %267 = arith.negf %266 : vector<2x32xf32>
    %268 = math.exp %267 : vector<2x32xf32>
    %cst_63 = arith.constant 1.000000e+00 : f32
    %269 = vector.broadcast %cst_63 : f32 to vector<2x32xf32>
    %270 = arith.addf %269, %268 : vector<2x32xf32>
    %271 = arith.divf %269, %270 : vector<2x32xf32>
    %272 = arith.mulf %263, %245 : vector<2x32xf32>
    %273 = arith.mulf %257, %265 : vector<2x32xf32>
    %274 = arith.addf %272, %273 : vector<2x32xf32>
    %275 = math.tanh %274 : vector<2x32xf32>
    %276 = arith.mulf %271, %275 : vector<2x32xf32>
    %277 = vector.extract_strided_slice %248 {offsets = [2, 0], sizes = [2, 128], strides = [1, 1]} : vector<16x128xf32> to vector<2x128xf32>
    %cst_64 = arith.constant dense<0.000000e+00> : vector<2x128xf32>
    %278 = tpu.matmul %276, %240, %cst_64 {dimension_numbers = #tpu.dot_dimension_numbers<[1], [0], [0], [1], [0, 0, 1, 1], [], []>} : vector<2x32xf32>, vector<32x128xf32>, vector<2x128xf32> -> vector<2x128xf32>
    %279 = arith.addf %277, %278 : vector<2x128xf32>
    %280 = vector.extract_strided_slice %279 {offsets = [0, 0], sizes = [2, 32], strides = [1, 1]} : vector<2x128xf32> to vector<2x32xf32>
    %281 = arith.negf %280 : vector<2x32xf32>
    %282 = math.exp %281 : vector<2x32xf32>
    %cst_65 = arith.constant 1.000000e+00 : f32
    %283 = vector.broadcast %cst_65 : f32 to vector<2x32xf32>
    %284 = arith.addf %283, %282 : vector<2x32xf32>
    %285 = arith.divf %283, %284 : vector<2x32xf32>
    %286 = vector.extract_strided_slice %279 {offsets = [0, 32], sizes = [2, 32], strides = [1, 1]} : vector<2x128xf32> to vector<2x32xf32>
    %287 = arith.negf %286 : vector<2x32xf32>
    %288 = math.exp %287 : vector<2x32xf32>
    %cst_66 = arith.constant 1.000000e+00 : f32
    %289 = vector.broadcast %cst_66 : f32 to vector<2x32xf32>
    %290 = arith.addf %289, %288 : vector<2x32xf32>
    %291 = arith.divf %289, %290 : vector<2x32xf32>
    %292 = vector.extract_strided_slice %279 {offsets = [0, 64], sizes = [2, 32], strides = [1, 1]} : vector<2x128xf32> to vector<2x32xf32>
    %293 = math.tanh %292 : vector<2x32xf32>
    %294 = vector.extract_strided_slice %279 {offsets = [0, 96], sizes = [2, 32], strides = [1, 1]} : vector<2x128xf32> to vector<2x32xf32>
    %295 = arith.negf %294 : vector<2x32xf32>
    %296 = math.exp %295 : vector<2x32xf32>
    %cst_67 = arith.constant 1.000000e+00 : f32
    %297 = vector.broadcast %cst_67 : f32 to vector<2x32xf32>
    %298 = arith.addf %297, %296 : vector<2x32xf32>
    %299 = arith.divf %297, %298 : vector<2x32xf32>
    %300 = arith.mulf %291, %274 : vector<2x32xf32>
    %301 = arith.mulf %285, %293 : vector<2x32xf32>
    %302 = arith.addf %300, %301 : vector<2x32xf32>
    %303 = math.tanh %302 : vector<2x32xf32>
    %304 = arith.mulf %299, %303 : vector<2x32xf32>
    %305 = vector.extract_strided_slice %248 {offsets = [4, 0], sizes = [2, 128], strides = [1, 1]} : vector<16x128xf32> to vector<2x128xf32>
    %cst_68 = arith.constant dense<0.000000e+00> : vector<2x128xf32>
    %306 = tpu.matmul %304, %240, %cst_68 {dimension_numbers = #tpu.dot_dimension_numbers<[1], [0], [0], [1], [0, 0, 1, 1], [], []>} : vector<2x32xf32>, vector<32x128xf32>, vector<2x128xf32> -> vector<2x128xf32>
    %307 = arith.addf %305, %306 : vector<2x128xf32>
    %308 = vector.extract_strided_slice %307 {offsets = [0, 0], sizes = [2, 32], strides = [1, 1]} : vector<2x128xf32> to vector<2x32xf32>
    %309 = arith.negf %308 : vector<2x32xf32>
    %310 = math.exp %309 : vector<2x32xf32>
    %cst_69 = arith.constant 1.000000e+00 : f32
    %311 = vector.broadcast %cst_69 : f32 to vector<2x32xf32>
    %312 = arith.addf %311, %310 : vector<2x32xf32>
    %313 = arith.divf %311, %312 : vector<2x32xf32>
    %314 = vector.extract_strided_slice %307 {offsets = [0, 32], sizes = [2, 32], strides = [1, 1]} : vector<2x128xf32> to vector<2x32xf32>
    %315 = arith.negf %314 : vector<2x32xf32>
    %316 = math.exp %315 : vector<2x32xf32>
    %cst_70 = arith.constant 1.000000e+00 : f32
    %317 = vector.broadcast %cst_70 : f32 to vector<2x32xf32>
    %318 = arith.addf %317, %316 : vector<2x32xf32>
    %319 = arith.divf %317, %318 : vector<2x32xf32>
    %320 = vector.extract_strided_slice %307 {offsets = [0, 64], sizes = [2, 32], strides = [1, 1]} : vector<2x128xf32> to vector<2x32xf32>
    %321 = math.tanh %320 : vector<2x32xf32>
    %322 = vector.extract_strided_slice %307 {offsets = [0, 96], sizes = [2, 32], strides = [1, 1]} : vector<2x128xf32> to vector<2x32xf32>
    %323 = arith.negf %322 : vector<2x32xf32>
    %324 = math.exp %323 : vector<2x32xf32>
    %cst_71 = arith.constant 1.000000e+00 : f32
    %325 = vector.broadcast %cst_71 : f32 to vector<2x32xf32>
    %326 = arith.addf %325, %324 : vector<2x32xf32>
    %327 = arith.divf %325, %326 : vector<2x32xf32>
    %328 = arith.mulf %319, %302 : vector<2x32xf32>
    %329 = arith.mulf %313, %321 : vector<2x32xf32>
    %330 = arith.addf %328, %329 : vector<2x32xf32>
    %331 = math.tanh %330 : vector<2x32xf32>
    %332 = arith.mulf %327, %331 : vector<2x32xf32>
    %333 = vector.extract_strided_slice %248 {offsets = [6, 0], sizes = [2, 128], strides = [1, 1]} : vector<16x128xf32> to vector<2x128xf32>
    %cst_72 = arith.constant dense<0.000000e+00> : vector<2x128xf32>
    %334 = tpu.matmul %332, %240, %cst_72 {dimension_numbers = #tpu.dot_dimension_numbers<[1], [0], [0], [1], [0, 0, 1, 1], [], []>} : vector<2x32xf32>, vector<32x128xf32>, vector<2x128xf32> -> vector<2x128xf32>
    %335 = arith.addf %333, %334 : vector<2x128xf32>
    %336 = vector.extract_strided_slice %335 {offsets = [0, 0], sizes = [2, 32], strides = [1, 1]} : vector<2x128xf32> to vector<2x32xf32>
    %337 = arith.negf %336 : vector<2x32xf32>
    %338 = math.exp %337 : vector<2x32xf32>
    %cst_73 = arith.constant 1.000000e+00 : f32
    %339 = vector.broadcast %cst_73 : f32 to vector<2x32xf32>
    %340 = arith.addf %339, %338 : vector<2x32xf32>
    %341 = arith.divf %339, %340 : vector<2x32xf32>
    %342 = vector.extract_strided_slice %335 {offsets = [0, 32], sizes = [2, 32], strides = [1, 1]} : vector<2x128xf32> to vector<2x32xf32>
    %343 = arith.negf %342 : vector<2x32xf32>
    %344 = math.exp %343 : vector<2x32xf32>
    %cst_74 = arith.constant 1.000000e+00 : f32
    %345 = vector.broadcast %cst_74 : f32 to vector<2x32xf32>
    %346 = arith.addf %345, %344 : vector<2x32xf32>
    %347 = arith.divf %345, %346 : vector<2x32xf32>
    %348 = vector.extract_strided_slice %335 {offsets = [0, 64], sizes = [2, 32], strides = [1, 1]} : vector<2x128xf32> to vector<2x32xf32>
    %349 = math.tanh %348 : vector<2x32xf32>
    %350 = vector.extract_strided_slice %335 {offsets = [0, 96], sizes = [2, 32], strides = [1, 1]} : vector<2x128xf32> to vector<2x32xf32>
    %351 = arith.negf %350 : vector<2x32xf32>
    %352 = math.exp %351 : vector<2x32xf32>
    %cst_75 = arith.constant 1.000000e+00 : f32
    %353 = vector.broadcast %cst_75 : f32 to vector<2x32xf32>
    %354 = arith.addf %353, %352 : vector<2x32xf32>
    %355 = arith.divf %353, %354 : vector<2x32xf32>
    %356 = arith.mulf %347, %330 : vector<2x32xf32>
    %357 = arith.mulf %341, %349 : vector<2x32xf32>
    %358 = arith.addf %356, %357 : vector<2x32xf32>
    %359 = math.tanh %358 : vector<2x32xf32>
    %360 = arith.mulf %355, %359 : vector<2x32xf32>
    %361 = vector.extract_strided_slice %248 {offsets = [8, 0], sizes = [2, 128], strides = [1, 1]} : vector<16x128xf32> to vector<2x128xf32>
    %cst_76 = arith.constant dense<0.000000e+00> : vector<2x128xf32>
    %362 = tpu.matmul %360, %240, %cst_76 {dimension_numbers = #tpu.dot_dimension_numbers<[1], [0], [0], [1], [0, 0, 1, 1], [], []>} : vector<2x32xf32>, vector<32x128xf32>, vector<2x128xf32> -> vector<2x128xf32>
    %363 = arith.addf %361, %362 : vector<2x128xf32>
    %364 = vector.extract_strided_slice %363 {offsets = [0, 0], sizes = [2, 32], strides = [1, 1]} : vector<2x128xf32> to vector<2x32xf32>
    %365 = arith.negf %364 : vector<2x32xf32>
    %366 = math.exp %365 : vector<2x32xf32>
    %cst_77 = arith.constant 1.000000e+00 : f32
    %367 = vector.broadcast %cst_77 : f32 to vector<2x32xf32>
    %368 = arith.addf %367, %366 : vector<2x32xf32>
    %369 = arith.divf %367, %368 : vector<2x32xf32>
    %370 = vector.extract_strided_slice %363 {offsets = [0, 32], sizes = [2, 32], strides = [1, 1]} : vector<2x128xf32> to vector<2x32xf32>
    %371 = arith.negf %370 : vector<2x32xf32>
    %372 = math.exp %371 : vector<2x32xf32>
    %cst_78 = arith.constant 1.000000e+00 : f32
    %373 = vector.broadcast %cst_78 : f32 to vector<2x32xf32>
    %374 = arith.addf %373, %372 : vector<2x32xf32>
    %375 = arith.divf %373, %374 : vector<2x32xf32>
    %376 = vector.extract_strided_slice %363 {offsets = [0, 64], sizes = [2, 32], strides = [1, 1]} : vector<2x128xf32> to vector<2x32xf32>
    %377 = math.tanh %376 : vector<2x32xf32>
    %378 = vector.extract_strided_slice %363 {offsets = [0, 96], sizes = [2, 32], strides = [1, 1]} : vector<2x128xf32> to vector<2x32xf32>
    %379 = arith.negf %378 : vector<2x32xf32>
    %380 = math.exp %379 : vector<2x32xf32>
    %cst_79 = arith.constant 1.000000e+00 : f32
    %381 = vector.broadcast %cst_79 : f32 to vector<2x32xf32>
    %382 = arith.addf %381, %380 : vector<2x32xf32>
    %383 = arith.divf %381, %382 : vector<2x32xf32>
    %384 = arith.mulf %375, %358 : vector<2x32xf32>
    %385 = arith.mulf %369, %377 : vector<2x32xf32>
    %386 = arith.addf %384, %385 : vector<2x32xf32>
    %387 = math.tanh %386 : vector<2x32xf32>
    %388 = arith.mulf %383, %387 : vector<2x32xf32>
    %389 = vector.extract_strided_slice %248 {offsets = [10, 0], sizes = [2, 128], strides = [1, 1]} : vector<16x128xf32> to vector<2x128xf32>
    %cst_80 = arith.constant dense<0.000000e+00> : vector<2x128xf32>
    %390 = tpu.matmul %388, %240, %cst_80 {dimension_numbers = #tpu.dot_dimension_numbers<[1], [0], [0], [1], [0, 0, 1, 1], [], []>} : vector<2x32xf32>, vector<32x128xf32>, vector<2x128xf32> -> vector<2x128xf32>
    %391 = arith.addf %389, %390 : vector<2x128xf32>
    %392 = vector.extract_strided_slice %391 {offsets = [0, 0], sizes = [2, 32], strides = [1, 1]} : vector<2x128xf32> to vector<2x32xf32>
    %393 = arith.negf %392 : vector<2x32xf32>
    %394 = math.exp %393 : vector<2x32xf32>
    %cst_81 = arith.constant 1.000000e+00 : f32
    %395 = vector.broadcast %cst_81 : f32 to vector<2x32xf32>
    %396 = arith.addf %395, %394 : vector<2x32xf32>
    %397 = arith.divf %395, %396 : vector<2x32xf32>
    %398 = vector.extract_strided_slice %391 {offsets = [0, 32], sizes = [2, 32], strides = [1, 1]} : vector<2x128xf32> to vector<2x32xf32>
    %399 = arith.negf %398 : vector<2x32xf32>
    %400 = math.exp %399 : vector<2x32xf32>
    %cst_82 = arith.constant 1.000000e+00 : f32
    %401 = vector.broadcast %cst_82 : f32 to vector<2x32xf32>
    %402 = arith.addf %401, %400 : vector<2x32xf32>
    %403 = arith.divf %401, %402 : vector<2x32xf32>
    %404 = vector.extract_strided_slice %391 {offsets = [0, 64], sizes = [2, 32], strides = [1, 1]} : vector<2x128xf32> to vector<2x32xf32>
    %405 = math.tanh %404 : vector<2x32xf32>
    %406 = vector.extract_strided_slice %391 {offsets = [0, 96], sizes = [2, 32], strides = [1, 1]} : vector<2x128xf32> to vector<2x32xf32>
    %407 = arith.negf %406 : vector<2x32xf32>
    %408 = math.exp %407 : vector<2x32xf32>
    %cst_83 = arith.constant 1.000000e+00 : f32
    %409 = vector.broadcast %cst_83 : f32 to vector<2x32xf32>
    %410 = arith.addf %409, %408 : vector<2x32xf32>
    %411 = arith.divf %409, %410 : vector<2x32xf32>
    %412 = arith.mulf %403, %386 : vector<2x32xf32>
    %413 = arith.mulf %397, %405 : vector<2x32xf32>
    %414 = arith.addf %412, %413 : vector<2x32xf32>
    %415 = math.tanh %414 : vector<2x32xf32>
    %416 = arith.mulf %411, %415 : vector<2x32xf32>
    %417 = vector.extract_strided_slice %248 {offsets = [12, 0], sizes = [2, 128], strides = [1, 1]} : vector<16x128xf32> to vector<2x128xf32>
    %cst_84 = arith.constant dense<0.000000e+00> : vector<2x128xf32>
    %418 = tpu.matmul %416, %240, %cst_84 {dimension_numbers = #tpu.dot_dimension_numbers<[1], [0], [0], [1], [0, 0, 1, 1], [], []>} : vector<2x32xf32>, vector<32x128xf32>, vector<2x128xf32> -> vector<2x128xf32>
    %419 = arith.addf %417, %418 : vector<2x128xf32>
    %420 = vector.extract_strided_slice %419 {offsets = [0, 0], sizes = [2, 32], strides = [1, 1]} : vector<2x128xf32> to vector<2x32xf32>
    %421 = arith.negf %420 : vector<2x32xf32>
    %422 = math.exp %421 : vector<2x32xf32>
    %cst_85 = arith.constant 1.000000e+00 : f32
    %423 = vector.broadcast %cst_85 : f32 to vector<2x32xf32>
    %424 = arith.addf %423, %422 : vector<2x32xf32>
    %425 = arith.divf %423, %424 : vector<2x32xf32>
    %426 = vector.extract_strided_slice %419 {offsets = [0, 32], sizes = [2, 32], strides = [1, 1]} : vector<2x128xf32> to vector<2x32xf32>
    %427 = arith.negf %426 : vector<2x32xf32>
    %428 = math.exp %427 : vector<2x32xf32>
    %cst_86 = arith.constant 1.000000e+00 : f32
    %429 = vector.broadcast %cst_86 : f32 to vector<2x32xf32>
    %430 = arith.addf %429, %428 : vector<2x32xf32>
    %431 = arith.divf %429, %430 : vector<2x32xf32>
    %432 = vector.extract_strided_slice %419 {offsets = [0, 64], sizes = [2, 32], strides = [1, 1]} : vector<2x128xf32> to vector<2x32xf32>
    %433 = math.tanh %432 : vector<2x32xf32>
    %434 = vector.extract_strided_slice %419 {offsets = [0, 96], sizes = [2, 32], strides = [1, 1]} : vector<2x128xf32> to vector<2x32xf32>
    %435 = arith.negf %434 : vector<2x32xf32>
    %436 = math.exp %435 : vector<2x32xf32>
    %cst_87 = arith.constant 1.000000e+00 : f32
    %437 = vector.broadcast %cst_87 : f32 to vector<2x32xf32>
    %438 = arith.addf %437, %436 : vector<2x32xf32>
    %439 = arith.divf %437, %438 : vector<2x32xf32>
    %440 = arith.mulf %431, %414 : vector<2x32xf32>
    %441 = arith.mulf %425, %433 : vector<2x32xf32>
    %442 = arith.addf %440, %441 : vector<2x32xf32>
    %443 = math.tanh %442 : vector<2x32xf32>
    %444 = arith.mulf %439, %443 : vector<2x32xf32>
    %445 = vector.extract_strided_slice %248 {offsets = [14, 0], sizes = [2, 128], strides = [1, 1]} : vector<16x128xf32> to vector<2x128xf32>
    %cst_88 = arith.constant dense<0.000000e+00> : vector<2x128xf32>
    %446 = tpu.matmul %444, %240, %cst_88 {dimension_numbers = #tpu.dot_dimension_numbers<[1], [0], [0], [1], [0, 0, 1, 1], [], []>} : vector<2x32xf32>, vector<32x128xf32>, vector<2x128xf32> -> vector<2x128xf32>
    %447 = arith.addf %445, %446 : vector<2x128xf32>
    %448 = vector.extract_strided_slice %447 {offsets = [0, 0], sizes = [2, 32], strides = [1, 1]} : vector<2x128xf32> to vector<2x32xf32>
    %449 = arith.negf %448 : vector<2x32xf32>
    %450 = math.exp %449 : vector<2x32xf32>
    %cst_89 = arith.constant 1.000000e+00 : f32
    %451 = vector.broadcast %cst_89 : f32 to vector<2x32xf32>
    %452 = arith.addf %451, %450 : vector<2x32xf32>
    %453 = arith.divf %451, %452 : vector<2x32xf32>
    %454 = vector.extract_strided_slice %447 {offsets = [0, 32], sizes = [2, 32], strides = [1, 1]} : vector<2x128xf32> to vector<2x32xf32>
    %455 = arith.negf %454 : vector<2x32xf32>
    %456 = math.exp %455 : vector<2x32xf32>
    %cst_90 = arith.constant 1.000000e+00 : f32
    %457 = vector.broadcast %cst_90 : f32 to vector<2x32xf32>
    %458 = arith.addf %457, %456 : vector<2x32xf32>
    %459 = arith.divf %457, %458 : vector<2x32xf32>
    %460 = vector.extract_strided_slice %447 {offsets = [0, 64], sizes = [2, 32], strides = [1, 1]} : vector<2x128xf32> to vector<2x32xf32>
    %461 = math.tanh %460 : vector<2x32xf32>
    %462 = vector.extract_strided_slice %447 {offsets = [0, 96], sizes = [2, 32], strides = [1, 1]} : vector<2x128xf32> to vector<2x32xf32>
    %463 = arith.negf %462 : vector<2x32xf32>
    %464 = math.exp %463 : vector<2x32xf32>
    %cst_91 = arith.constant 1.000000e+00 : f32
    %465 = vector.broadcast %cst_91 : f32 to vector<2x32xf32>
    %466 = arith.addf %465, %464 : vector<2x32xf32>
    %467 = arith.divf %465, %466 : vector<2x32xf32>
    %468 = arith.mulf %459, %442 : vector<2x32xf32>
    %469 = arith.mulf %453, %461 : vector<2x32xf32>
    %470 = arith.addf %468, %469 : vector<2x32xf32>
    %471 = math.tanh %470 : vector<2x32xf32>
    %472 = arith.mulf %467, %471 : vector<2x32xf32>
    %473 = tpu.concatenate %388, %416, %444, %472 in 0 : vector<2x32xf32>, vector<2x32xf32>, vector<2x32xf32>, vector<2x32xf32> -> vector<8x32xf32>
    %c0_92 = arith.constant 0 : index
    %c0_93 = arith.constant 0 : index
    %474 = vector.load %arg7[%c0_92, %c0_93] : memref<32x2xf32, #tpu.memory_space<vmem>>, vector<32x2xf32>
    %cst_94 = arith.constant dense<0.000000e+00> : vector<8x2xf32>
    %475 = tpu.matmul %473, %474, %cst_94 {dimension_numbers = #tpu.dot_dimension_numbers<[1], [0], [0], [1], [0, 0, 1, 1], [], []>} : vector<8x32xf32>, vector<32x2xf32>, vector<8x2xf32> -> vector<8x2xf32>
    %c0_95 = arith.constant 0 : index
    %c0_96 = arith.constant 0 : index
    %476 = vector.load %arg8[%c0_95, %c0_96] : memref<1x2xf32, #tpu.memory_space<vmem>>, vector<1x2xf32>
    %477 = vector.broadcast %476 : vector<1x2xf32> to vector<8x2xf32>
    %478 = arith.addf %475, %477 : vector<8x2xf32>
    %c0_97 = arith.constant 0 : index
    %c0_98 = arith.constant 0 : index
    %479 = vector.load %arg9[%c0_97, %c0_98] : memref<8x2xf32, #tpu.memory_space<vmem>>, vector<8x2xf32>
    tpu.vector_store %arg9[%c0_97, %c0_98], %478 {strides = array<i32>} : memref<8x2xf32, #tpu.memory_space<vmem>>, vector<8x2xf32>,
    return
  }
}

</mosaic_0001>

<bundles_post_ra>
// kernel: lstm_model_forward.1
= control target key start
LH: loop header
LB: loop body
LE: loop exit
PB: predicated region body
PF: predicated region fallthrough
CT: control target
= control target key end

     0   :  { %14 = vsyncpa [#allocation3], 0  ;;  %s3192_s0 = inlined_call_operand.vmem [shape: f32[16,4], index: 0, kind: input, shape index: {}]   ;;  %s3193_s1 = inlined_call_operand.hbm [shape: f32[2,2,32], index: 1, kind: input, shape index: {}]   ;;  %s3194_s2 = inlined_call_operand.hbm [shape: f32[2,2,32], index: 2, kind: input, shape index: {}]   ;;  %s3195_s3 = inlined_call_operand.hbm [shape: f32[4,128], index: 3, kind: input, shape index: {}]   ;;  %s3196_s4 = inlined_call_operand.vmem [shape: f32[1,32,128], index: 4, kind: input, shape index: {}]   ;;  %s3197_s5 = inlined_call_operand.vmem [shape: f32[2,32,128], index: 5, kind: input, shape index: {}]   ;;  %s3198_s6 = inlined_call_operand.hbm [shape: f32[2,128], index: 6, kind: input, shape index: {}]   ;;  %s3199_s7 = inlined_call_operand.vmem [shape: f32[32,2], index: 7, kind: input, shape index: {}]   ;;  %s3200_s8 = inlined_call_operand.vmem [shape: f32[1,2], index: 8, kind: input, shape index: {}]   ;;  %s3201_s9 = inlined_call_operand.vmem [shape: f32[8,2], index: 9, kind: output, shape index: {}]  }
   0x1   :  { %15 = vsyncpa [#allocation5], 0 }
   0x2   :  { %16 = vsyncpa [#allocation8], 0  ;;  %s2769_s30 = smov [#allocation4]   ;;  %s2770_s11 = smov [#allocation2]  }
   0x3   :  { %s36_s10 = sshll.u32 %s2769_s30, 4  ;;  %s24_s12 = sshll.u32 %s2770_s11, 4  ;;  %s37_s10 = int_to_ptr.vmem [resolvable:$true] %s36_s10  ;;  %s2829_s12 = int_to_ptr.vmem [resolvable:$true] %s24_s12 }
   0x4   :  { %s2675_s15 = scalar_lea.hbm %s3194_s2, 64 }
   0x5   :  { %p2676_p0 = scmp.ne.s32.totalorder %s3194_s2, %s2675_s15  ;;  %p2679_p1 = scmp.lt.u32.totalorder %s2675_s15, %s3194_s2 }
   0x7   :  { %p2681_p2 = pnand %p2679_p1, %p2676_p0 }
   0x9   :  { %2684 = shalt.err (!%p2681_p2)
}
   0xa   :  { %s2685_s20 = scalar_lea.vmem %s37_s10, 64  ;;  %p2690_p4 = scmp.lt.s32.totalorder %s37_s10, %s37_s10 }
   0xb   :  { %p2686_p3 = scmp.ne.s32.totalorder %s37_s10, %s2685_s20  ;;  %p2691_p5 = scmp.lt.s32.totalorder %s2685_s20, %s2685_s20 }
   0xd   :  { %p2692_p6 = por %p2691_p5, %p2690_p4 }
   0xf   :  { %p2693_p7 = pnand %p2692_p6, %p2686_p3 }
  0x11   :  { %2696 = shalt.err (!%p2693_p7)
}
  0x12   :  { %s2771_s21 = smov 32   ;;  %s2772_s22 = smov 2  }
  0x13   :  { %42 = dma.hbm_to_vmem [thread:$0]  %s3194_s2, 64, %s37_s10, [#allocation5], %s2771_s21, %s2771_s21, %s2772_s22  }
  0x14   :  { %s2697_s27 = scalar_lea.hbm %s3193_s1, 64 }
  0x15   :  { %p2698_p8 = scmp.ne.s32.totalorder %s3193_s1, %s2697_s27  ;;  %p2701_p9 = scmp.lt.u32.totalorder %s2697_s27, %s3193_s1 }
  0x17   :  { %p2703_p10 = pnand %p2701_p9, %p2698_p8 }
  0x19   :  { %2706 = shalt.err (!%p2703_p10)
}
  0x1a   :  { %s2707_s13 = scalar_lea.vmem %s2829_s12, 64  ;;  %p2712_p12 = scmp.lt.s32.totalorder %s2829_s12, %s2829_s12 }
  0x1b   :  { %p2708_p11 = scmp.ne.s32.totalorder %s2829_s12, %s2707_s13  ;;  %p2713_p13 = scmp.lt.s32.totalorder %s2707_s13, %s2707_s13 }
  0x1d   :  { %p2714_p0 = por %p2713_p13, %p2712_p12 }
  0x1f   :  { %p2715_p1 = pnand %p2714_p0, %p2708_p11 }
  0x21   :  { %2718 = shalt.err (!%p2715_p1)
}
  0x22   :  { %30 = dma.hbm_to_vmem [thread:$0]  %s3193_s1, 64, %s2829_s12, [#allocation3], %s2771_s21, %s2771_s21, %s2772_s22  }
  0x23   :  { %s2773_s14 = smov [#allocation6]   ;;  %s2774_s16 = smov [#allocation7]  }
  0x24   :  { %s49_s15 = sshll.u32 %s2773_s14, 4  ;;  %s63_s17 = sshll.u32 %s2774_s16, 4  ;;  %s50_s15 = int_to_ptr.vmem [resolvable:$true] %s49_s15  ;;  %s64_s17 = int_to_ptr.vmem [resolvable:$true] %s63_s17 }
  0x25   :  { %s2719_s20 = scalar_lea.hbm %s3195_s3, 64 }
  0x26   :  { %p2720_p2 = scmp.ne.s32.totalorder %s3195_s3, %s2719_s20  ;;  %p2723_p3 = scmp.lt.u32.totalorder %s2719_s20, %s3195_s3 }
  0x28   :  { %p2725_p4 = pnand %p2723_p3, %p2720_p2 }
  0x2a   :  { %2728 = shalt.err (!%p2725_p4)
}
  0x2b   :  { %s2729_s1 = scalar_lea.vmem %s50_s15, 64  ;;  %p2734_p6 = scmp.lt.s32.totalorder %s50_s15, %s50_s15 }
  0x2c   :  { %p2730_p5 = scmp.ne.s32.totalorder %s50_s15, %s2729_s1  ;;  %p2735_p7 = scmp.lt.s32.totalorder %s2729_s1, %s2729_s1 }
  0x2e   :  { %p2736_p8 = por %p2735_p7, %p2734_p6 }
  0x30   :  { %p2737_p9 = pnand %p2736_p8, %p2730_p5 }
  0x32   :  { %2740 = shalt.err (!%p2737_p9)
}
  0x33   :  { %52 = dma.hbm_to_vmem [thread:$0]  %s3195_s3, 64, %s50_s15, [#allocation5]  }
  0x34   :  { %s2741_s29 = scalar_lea.hbm %s3198_s6, 32 }
  0x35   :  { %p2742_p10 = scmp.ne.s32.totalorder %s3198_s6, %s2741_s29  ;;  %p2745_p11 = scmp.lt.u32.totalorder %s2741_s29, %s3198_s6 }
  0x37   :  { %p2747_p12 = pnand %p2745_p11, %p2742_p10 }
  0x39   :  { %2750 = shalt.err (!%p2747_p12)
}
  0x3a   :  { %s2751_s10 = scalar_lea.vmem %s64_s17, 32  ;;  %p2756_p0 = scmp.lt.s32.totalorder %s64_s17, %s64_s17 }
  0x3b   :  { %p2752_p13 = scmp.ne.s32.totalorder %s64_s17, %s2751_s10  ;;  %p2757_p1 = scmp.lt.s32.totalorder %s2751_s10, %s2751_s10 }
  0x3d   :  { %p2758_p2 = por %p2757_p1, %p2756_p0 }
  0x3f   :  { %p2759_p3 = pnand %p2758_p2, %p2752_p13 }
  0x41   :  { %2762 = shalt.err (!%p2759_p3)
}
  0x42   :  { %66 = dma.hbm_to_vmem [thread:$0]  %s3198_s6, 32, %s64_s17, [#allocation8]  }
  0x43   :  { %2763 = dma.done.wait [#allocation3], 64  }
  0x44   :  { %2764 = vsyncadd [#allocation3], 4294967232 }
  0x45   :  { %2765 = dma.done.wait [#allocation5], 128  }
  0x46   :  { %2766 = vsyncadd [#allocation5], 4294967168 }
  0x47   :  { %2767 = dma.done.wait [#allocation8], 32  }
  0x48   :  { %2768 = vsyncadd [#allocation8], 4294967264  ;;  %v2775_v0 = vmov 0.0|0.0   ;;  %vm2776_vm0 = vmmov 0   ;;  %v2777_v1 = vmov 0.0   ;;  %vm104_vm1 = vcmask 1043456  }
  0x49   :  { %2427 = vmatprep.subr.bf16.mxu1 %v2775_v0  ;;  %2237 = vmatprep.mubr.msk.f32.mxu1 %vm2776_vm0, %v2777_v1  ;;  %vm97_vm2 = vcmask 31744   ;;  %v86_v2 = vld [vmem:[%s3197_s5] sm:$0xff]  ;;  %v87_v3 = vld [vmem:[%s3197_s5 + $0x8] sm:$0xff]  ;;  %v88_v8 = vld [vmem:[%s3197_s5 + $0x10] sm:$0xff]  ;;  %vm183_vm3 = vcmask 261120   ;;  %vm1030_vm4 = vcmask 1041408  }
  0x4a   :  { %v85_v4 = vld [vmem:[#allocation6] sm:$0xf]  ;;  %v2897_v5 = vpack.c.bf16 %v87_v3, %v86_v2  ;;  %v83_v6 = vld [vmem:[%s3192_s0] sm:$0xff]  ;;  %v89_v9 = vld [vmem:[%s3197_s5 + $0x18] sm:$0xff]  ;;  %vm1033_vm5 = vcmask 1045504   ;;  %vm2076_vm6 = vcmask 15360  }
  0x4b   :  { %2224 = vmatprep.subr.msk.mxu0 %vm104_vm1, %v85_v4  ;;  %v84_v7 = vld [vmem:[%s3192_s0 + $0x8] sm:$0xff]  ;;  %2226 = vmatprep.mubr.msk.f32.mxu0 %vm97_vm2, %v83_v6  ;;  %v2914_v10 = vpack.c.bf16 %v89_v9, %v88_v8  ;;  %v91_v11 = vld [vmem:[#allocation2] sm:$0x3]  ;;  %s2778_s0 = smov 64   ;;  %v92_v21 = vld [vmem:[#allocation4] sm:$0x3] }
  0x4c   :  { %2225 = vmatpush3.msk.msra.mxu0 %vm104_vm1, %v85_v4  ;;  %2429 = vmatpush3.bf16.msra.mxu1 %v2897_v5  ;;  %v2085_v12 = vld [vmem:[#allocation7] ss:$0 sm:$0xff] }
  0x4d   :  { %2227 = vmatmul.mubr.msk.f32.vlgmr.msra.gmra.mrb[0].mxu0 %vm97_vm2, %v84_v7  ;;  %2430 = vmatprep.subr.bf16.mxu1 %v2775_v0 }
  0x4e   :  { %2433 = vmatprep.subr.bf16.mxu0 %v2775_v0  ;;  %2248 = vmatprep.mubr.msk.f32.mxu0 %vm2776_vm0, %v2777_v1 }
  0x4f   :  { %2435 = vmatpush3.bf16.msra.mxu0 %v2897_v5 }
  0x50   :  { %2436 = vmatprep.subr.bf16.mxu0 %v2775_v0  ;;  %2432 = vmatpush3.bf16.msra.mxu1 %v2914_v10 }
  0x51   :  { %2439 = vmatprep.subr.bf16.mxu1 %v2775_v0 }
  0x53   :  { %2438 = vmatpush3.bf16.msra.mxu0 %v2914_v10  ;;  %2238 = vmatmul.mubr.msk.f32.vlgmr.msra.gmra.mrb[0].mxu1 %vm183_vm3, %v91_v11 }
  0x54   :  { %2445 = vmatprep.subr.bf16.mxu0 %v2775_v0  ;;  %2441 = vmatpush3.bf16.msra.mxu1 %v2897_v5 }
  0x55   :  { %2259 = vmatprep.mubr.msk.f32.mxu1 %vm2776_vm0, %v2777_v1  ;;  %2442 = vmatprep.subr.bf16.mxu1 %v2775_v0 }
  0x58   :  { %2444 = vmatpush3.bf16.msra.mxu1 %v2914_v10 }
  0x59   :  { %2451 = vmatprep.subr.bf16.mxu1 %v2775_v0 }
 0x120   :  { %v2228_v13 = vpop.f32.mrb[0].mxu0 }
 0x121   :  { %v2933_v14 = vadd.f32 %v2228_v13, %v2085_v12  ;;  %v174_v15 = vpop.f32.mrb[1].mxu0 }
 0x122   :  { %v2935_v16 = vadd.f32 %v2085_v12, %v174_v15 }
 0x126   :  { %v253_v17 = vpop.f32.mrb[0].mxu1 }
 0x127   :  { %v257_v18 = vadd.f32 %v253_v17, %v2935_v16  ;;  %v2239_v19 = vpop.f32.mrb[1].mxu1 }
 0x129   :  { %2547 = vtanh.f32 %v257_v18  ;;  %v2090_v22 = vmul.f32 -1.442695, %v257_v18 }
 0x12b   :  { %2549 = vpow2.f32 %v2090_v22 }
 0x133   :  { %v2548_v20 = vpop.eup %2547 }
 0x134   :  { %271 = vrot.lane.b32.xlu0 %v2548_v20, %s2778_s0 }
 0x135   :  { %v2550_v23 = vpop.eup %2549 }
 0x136   :  { %v261_v24 = vadd.f32 1.0, %v2550_v23 }
 0x138   :  { %266 = vrot.lane.b32.xlu0 %v92_v21, %s2771_s21  ;;  %2551 = vrcp.f32 %v261_v24 }
 0x142   :  { %v2552_v25 = vpop.eup %2551 }
 0x1a6   :  { %v272_v26 = vpop.permute.xlu0 %271 }
 0x1a7   :  { %v274_v27 = vmul.f32 %v2552_v25, %v272_v26 }
 0x1a9   :  { %276 = vrot.lane.b32.xlu1 %v274_v27, %s2771_s21 }
 0x1aa   :  { %v267_v28 = vpop.permute.xlu0 %266 }
 0x1ab   :  { %v269_v29 = vmul.f32 %v2552_v25, %v267_v28 }
 0x21b   :  { %v277_v30 = vpop.permute.xlu1 %276 }
 0x21c   :  { %v279_v31 = vadd.f32 %v277_v30, %v269_v29 }
 0x21e   :  { %2553 = vtanh.f32 %v279_v31  ;;  %v373_v47 = vrot.slane %v279_v31, 6 }
 0x228   :  { %v2554_v32 = vpop.eup %2553 }
 0x229   :  { %282 = vrot.lane.b32.xlu1 %v2554_v32, %s2778_s0 }
 0x29b   :  { %v283_v33 = vpop.permute.xlu1 %282 }
 0x29c   :  { %v2942_v34 = vmul.f32 %v2552_v25, %v283_v33 }
 0x29e   :  { %287 = vrot.lane.b32.xlu0 %v2942_v34, %s2771_s21 }
 0x310   :  { %v288_v35 = vpop.permute.xlu0 %287 }
 0x311   :  { %2249 = vmatmul.mubr.msk.f32.vlgmr.msra.gmra.mrb[2].mxu0 %vm183_vm3, %v288_v35 }
 0x312   :  { %2447 = vmatpush3.bf16.msra.mxu0 %v2897_v5  ;;  %2270 = vmatprep.mubr.msk.f32.mxu0 %vm2776_vm0, %v2777_v1 }
 0x313   :  { %2448 = vmatprep.subr.bf16.mxu0 %v2775_v0 }
 0x316   :  { %2450 = vmatpush3.bf16.msra.mxu0 %v2914_v10 }
 0x317   :  { %2457 = vmatprep.subr.bf16.mxu0 %v2775_v0 }
 0x3e4   :  { %v357_v36 = vpop.f32.mrb[2].mxu0 }
 0x3e5   :  { %v362_v37 = vrot.slane %v357_v36, 6  ;;  %v2250_v38 = vpop.f32.mrb[3].mxu0 }
 0x3e7   :  { %v364_v39 = vadd.f32 %v362_v37, %v2935_v16 }
 0x3e9   :  { %2555 = vtanh.f32 %v364_v39  ;;  %v2092_v41 = vmul.f32 -1.442695, %v364_v39 }
 0x3eb   :  { %2557 = vpow2.f32 %v2092_v41 }
 0x3f3   :  { %v2556_v40 = vpop.eup %2555 }
 0x3f4   :  { %377 = vrot.lane.b32.xlu1 %v2556_v40, %s2778_s0 }
 0x3f5   :  { %v2558_v42 = vpop.eup %2557 }
 0x3f6   :  { %v368_v43 = vadd.f32 1.0, %v2558_v42 }
 0x3f8   :  { %2559 = vrcp.f32 %v368_v43 }
 0x402   :  { %v2560_v44 = vpop.eup %2559 }
 0x403   :  { %v375_v48 = vmul.f32 %v2560_v44, %v373_v47 }
 0x466   :  { %v378_v45 = vpop.permute.xlu1 %377 }
 0x467   :  { %v380_v46 = vmul.f32 %v2560_v44, %v378_v45 }
 0x469   :  { %382 = vrot.lane.b32.xlu0 %v380_v46, %s2771_s21 }
 0x4db   :  { %v383_v49 = vpop.permute.xlu0 %382 }
 0x4dc   :  { %v385_v50 = vadd.f32 %v383_v49, %v375_v48 }
 0x4de   :  { %2561 = vtanh.f32 %v385_v50  ;;  %v480_v6 = vrot.slane %v385_v50, 6 }
 0x4e8   :  { %v2562_v51 = vpop.eup %2561 }
 0x4e9   :  { %388 = vrot.lane.b32.xlu1 %v2562_v51, %s2778_s0 }
 0x55b   :  { %v389_v52 = vpop.permute.xlu1 %388 }
 0x55c   :  { %v391_v53 = vmul.f32 %v2560_v44, %v389_v52 }
 0x55e   :  { %v393_v54 = vrot.slane %v391_v53, 2  ;;  %v1031_v15 = vsel %vm1030_vm4, %v2942_v34, %v391_v53 }
 0x560   :  { %394 = vrot.lane.b32.xlu0 %v393_v54, %s2771_s21 }
 0x5d2   :  { %v395_v55 = vpop.permute.xlu0 %394 }
 0x5d3   :  { %2260 = vmatmul.mubr.msk.f32.vlgmr.msra.gmra.mrb[2].mxu1 %vm183_vm3, %v395_v55 }
 0x5d4   :  { %2453 = vmatpush3.bf16.msra.mxu1 %v2897_v5  ;;  %2281 = vmatprep.mubr.msk.f32.mxu1 %vm2776_vm0, %v2777_v1 }
 0x5d5   :  { %2454 = vmatprep.subr.bf16.mxu1 %v2775_v0 }
 0x5d8   :  { %2456 = vmatpush3.bf16.msra.mxu1 %v2914_v10 }
 0x5d9   :  { %2463 = vmatprep.subr.bf16.mxu1 %v2775_v0 }
 0x6a6   :  { %v464_v56 = vpop.f32.mrb[2].mxu1 }
 0x6a7   :  { %v469_v57 = vrot.slane %v464_v56, 4  ;;  %v2261_v58 = vpop.f32.mrb[3].mxu1 }
 0x6a9   :  { %v471_v59 = vadd.f32 %v469_v57, %v2935_v16 }
 0x6ab   :  { %2563 = vtanh.f32 %v471_v59  ;;  %v2094_v61 = vmul.f32 -1.442695, %v471_v59 }
 0x6ad   :  { %2565 = vpow2.f32 %v2094_v61 }
 0x6b5   :  { %v2564_v60 = vpop.eup %2563 }
 0x6b6   :  { %484 = vrot.lane.b32.xlu1 %v2564_v60, %s2778_s0 }
 0x6b7   :  { %v2566_v62 = vpop.eup %2565 }
 0x6b8   :  { %v475_v63 = vadd.f32 1.0, %v2566_v62 }
 0x6ba   :  { %2567 = vrcp.f32 %v475_v63 }
 0x6c4   :  { %v2568_v2 = vpop.eup %2567 }
 0x6c5   :  { %v482_v7 = vmul.f32 %v2568_v2, %v480_v6 }
 0x728   :  { %v485_v3 = vpop.permute.xlu1 %484 }
 0x729   :  { %v487_v4 = vmul.f32 %v2568_v2, %v485_v3 }
 0x72b   :  { %489 = vrot.lane.b32.xlu0 %v487_v4, %s2771_s21 }
 0x79d   :  { %v490_v8 = vpop.permute.xlu0 %489 }
 0x79e   :  { %v492_v9 = vadd.f32 %v490_v8, %v482_v7 }
 0x7a0   :  { %2569 = vtanh.f32 %v492_v9  ;;  %v587_v31 = vrot.slane %v492_v9, 6 }
 0x7aa   :  { %v2570_v11 = vpop.eup %2569 }
 0x7ab   :  { %495 = vrot.lane.b32.xlu1 %v2570_v11, %s2778_s0 }
 0x81d   :  { %v496_v12 = vpop.permute.xlu1 %495 }
 0x81e   :  { %v498_v13 = vmul.f32 %v2568_v2, %v496_v12 }
 0x820   :  { %v500_v17 = vrot.slane %v498_v13, 4  ;;  %v1032_v18 = vsel %vm104_vm1, %v1031_v15, %v498_v13 }
 0x822   :  { %501 = vrot.lane.b32.xlu0 %v500_v17, %s2771_s21 }
 0x894   :  { %v502_v19 = vpop.permute.xlu0 %501 }
 0x895   :  { %2271 = vmatmul.mubr.msk.f32.vlgmr.msra.gmra.mrb[4].mxu0 %vm183_vm3, %v502_v19 }
 0x896   :  { %2459 = vmatpush3.bf16.msra.mxu0 %v2897_v5  ;;  %2292 = vmatprep.mubr.msk.f32.mxu0 %vm2776_vm0, %v2777_v1 }
 0x897   :  { %2460 = vmatprep.subr.bf16.mxu0 %v2775_v0 }
 0x89a   :  { %2462 = vmatpush3.bf16.msra.mxu0 %v2914_v10 }
 0x89b   :  { %2469 = vmatprep.subr.bf16.mxu0 %v2775_v0 }
 0x968   :  { %v571_v20 = vpop.f32.mrb[4].mxu0 }
 0x969   :  { %v576_v21 = vrot.slane %v571_v20, 2  ;;  %v2272_v22 = vpop.f32.mrb[5].mxu0 }
 0x96b   :  { %v578_v23 = vadd.f32 %v576_v21, %v2935_v16 }
 0x96d   :  { %2571 = vtanh.f32 %v578_v23  ;;  %v2096_v25 = vmul.f32 -1.442695, %v578_v23 }
 0x96f   :  { %2573 = vpow2.f32 %v2096_v25 }
 0x977   :  { %v2572_v24 = vpop.eup %2571 }
 0x978   :  { %591 = vrot.lane.b32.xlu1 %v2572_v24, %s2778_s0 }
 0x979   :  { %v2574_v26 = vpop.eup %2573 }
 0x97a   :  { %v582_v27 = vadd.f32 1.0, %v2574_v26 }
 0x97c   :  { %2575 = vrcp.f32 %v582_v27 }
 0x986   :  { %v2576_v28 = vpop.eup %2575 }
 0x987   :  { %v589_v32 = vmul.f32 %v2576_v28, %v587_v31 }
 0x9ea   :  { %v592_v29 = vpop.permute.xlu1 %591 }
 0x9eb   :  { %v594_v30 = vmul.f32 %v2576_v28, %v592_v29 }
 0x9ed   :  { %596 = vrot.lane.b32.xlu0 %v594_v30, %s2771_s21 }
 0xa5f   :  { %v597_v33 = vpop.permute.xlu0 %596 }
 0xa60   :  { %v599_v34 = vadd.f32 %v597_v33, %v589_v32 }
 0xa62   :  { %2577 = vtanh.f32 %v599_v34  ;;  %v691_v50 = vrot.slane %v599_v34, 6 }
 0xa6c   :  { %v2578_v16 = vpop.eup %2577 }
 0xa6d   :  { %602 = vrot.lane.b32.xlu1 %v2578_v16, %s2778_s0 }
 0xadf   :  { %v603_v35 = vpop.permute.xlu1 %602 }
 0xae0   :  { %v605_v36 = vmul.f32 %v2576_v28, %v603_v35 }
 0xae2   :  { %v607_v37 = vrot.slane %v605_v36, 6  ;;  %v2985_v38 = vsel %vm1033_vm5, %v1032_v18, %v605_v36 }
 0xae4   :  { %608 = vrot.lane.b32.xlu0 %v607_v37, %s2771_s21 }
 0xb56   :  { %v609_v39 = vpop.permute.xlu0 %608 }
 0xb57   :  { %2282 = vmatmul.mubr.msk.f32.vlgmr.msra.gmra.mrb[4].mxu1 %vm183_vm3, %v609_v39 }
 0xb58   :  { %2465 = vmatpush3.bf16.msra.mxu1 %v2897_v5  ;;  %2303 = vmatprep.mubr.msk.f32.mxu1 %vm2776_vm0, %v2777_v1 }
 0xb59   :  { %2466 = vmatprep.subr.bf16.mxu1 %v2775_v0 }
 0xb5c   :  { %2468 = vmatpush3.bf16.msra.mxu1 %v2914_v10 }
 0xc2a   :  { %v678_v40 = vpop.f32.mrb[4].mxu1 }
 0xc2b   :  { %v682_v41 = vadd.f32 %v678_v40, %v2933_v14  ;;  %v2283_v42 = vpop.f32.mrb[5].mxu1 }
 0xc2d   :  { %2579 = vtanh.f32 %v682_v41  ;;  %v2098_v44 = vmul.f32 -1.442695, %v682_v41 }
 0xc2f   :  { %2581 = vpow2.f32 %v2098_v44 }
 0xc37   :  { %v2580_v43 = vpop.eup %2579 }
 0xc38   :  { %695 = vrot.lane.b32.xlu1 %v2580_v43, %s2778_s0 }
 0xc39   :  { %v2582_v45 = vpop.eup %2581 }
 0xc3a   :  { %v686_v46 = vadd.f32 1.0, %v2582_v45 }
 0xc3c   :  { %2583 = vrcp.f32 %v686_v46 }
 0xc46   :  { %v2584_v47 = vpop.eup %2583 }
 0xc47   :  { %v693_v51 = vmul.f32 %v2584_v47, %v691_v50 }
 0xcaa   :  { %v696_v48 = vpop.permute.xlu1 %695 }
 0xcab   :  { %v698_v49 = vmul.f32 %v2584_v47, %v696_v48 }
 0xcad   :  { %700 = vrot.lane.b32.xlu0 %v698_v49, %s2771_s21 }
 0xd1f   :  { %v701_v52 = vpop.permute.xlu0 %700 }
 0xd20   :  { %v703_v53 = vadd.f32 %v701_v52, %v693_v51 }
 0xd22   :  { %2585 = vtanh.f32 %v703_v53 }
 0xd2c   :  { %v2586_v54 = vpop.eup %2585 }
 0xd2d   :  { %706 = vrot.lane.b32.xlu1 %v2586_v54, %s2778_s0 }
 0xd9f   :  { %v707_v55 = vpop.permute.xlu1 %706 }
 0xda0   :  { %v2998_v56 = vmul.f32 %v2584_v47, %v707_v55  ;;  %v1038_v55 = vld [vmem:[%s3196_s4] sm:$0xff] }
 0xda2   :  { %711 = vrot.lane.b32.xlu0 %v2998_v56, %s2771_s21 }
 0xe14   :  { %v712_v57 = vpop.permute.xlu0 %711 }
 0xe15   :  { %2293 = vmatmul.mubr.msk.f32.vlgmr.msra.gmra.mrb[6].mxu0 %vm183_vm3, %v712_v57  ;;  %v2105_v57 = vld [vmem:[%s3197_s5 + $0x20] sm:$0xff] }
 0xe16   :  { %2471 = vmatpush3.bf16.msra.mxu0 %v2897_v5  ;;  %2314 = vmatprep.mubr.msk.f32.mxu0 %vm2776_vm0, %v2777_v1 }
 0xe17   :  { %2472 = vmatprep.subr.bf16.mxu0 %v2775_v0 }
 0xe1a   :  { %2474 = vmatpush3.bf16.msra.mxu0 %v2914_v10  ;;  %v797_v10 = vrot.slane %v703_v53, 6 }
 0xe1b   :  { %2483 = vmatprep.subr.bf16.mxu0 %v2775_v0 }
 0xee8   :  { %v781_v58 = vpop.f32.mrb[6].mxu0 }
 0xee9   :  { %v786_v59 = vrot.slane %v781_v58, 6  ;;  %v2294_v60 = vpop.f32.mrb[7].mxu0  ;;  %v2106_v58 = vld [vmem:[%s3197_s5 + $0x28] sm:$0xff] }
 0xeea   :  { %v1041_v60 = vld [vmem:[%s3196_s4 + $0x18] sm:$0xff] }
 0xeeb   :  { %v788_v61 = vadd.f32 %v786_v59, %v2933_v14  ;;  %v1040_v59 = vld [vmem:[%s3196_s4 + $0x10] sm:$0xff] }
 0xeed   :  { %2587 = vtanh.f32 %v788_v61  ;;  %v2100_v63 = vmul.f32 -1.442695, %v788_v61  ;;  %v3050_v61 = vpack.c.bf16 %v2106_v58, %v2105_v57 }
 0xeef   :  { %2589 = vpow2.f32 %v2100_v63  ;;  %v2107_v63 = vld [vmem:[%s3197_s5 + $0x30] sm:$0xff] }
 0xef7   :  { %v2588_v62 = vpop.eup %2587 }
 0xef8   :  { %801 = vrot.lane.b32.xlu1 %v2588_v62, %s2778_s0  ;;  %v2479_v62 = vpack.c.bf16 %v1041_v60, %v1040_v59 }
 0xef9   :  { %v2590_v5 = vpop.eup %2589 }
 0xefa   :  { %v792_v2 = vadd.f32 1.0, %v2590_v5  ;;  %v2108_v5 = vld [vmem:[%s3197_s5 + $0x38] sm:$0xff] }
 0xefc   :  { %2591 = vrcp.f32 %v792_v2  ;;  %v3059_v2 = vpack.c.bf16 %v2108_v5, %v2107_v63 }
 0xf06   :  { %v2592_v3 = vpop.eup %2591 }
 0xf07   :  { %v799_v7 = vmul.f32 %v2592_v3, %v797_v10 }
 0xf6a   :  { %v802_v4 = vpop.permute.xlu1 %801 }
 0xf6b   :  { %v804_v6 = vmul.f32 %v2592_v3, %v802_v4  ;;  %v1049_v4 = vld [vmem:[#allocation2 + $0x2] sm:$0x3] }
 0xf6d   :  { %806 = vrot.lane.b32.xlu0 %v804_v6, %s2771_s21 }
 0xfdf   :  { %v807_v8 = vpop.permute.xlu0 %806 }
 0xfe0   :  { %v809_v9 = vadd.f32 %v807_v8, %v799_v7  ;;  %v1051_v8 = vld [vmem:[#allocation4 + $0x2] sm:$0x3] }
 0xfe2   :  { %2593 = vtanh.f32 %v809_v9  ;;  %v904_v29 = vrot.slane %v809_v9, 6 }
 0xfec   :  { %v2594_v11 = vpop.eup %2593 }
 0xfed   :  { %812 = vrot.lane.b32.xlu1 %v2594_v11, %s2778_s0 }
0x105f   :  { %v813_v12 = vpop.permute.xlu1 %812 }
0x1060   :  { %v815_v13 = vmul.f32 %v2592_v3, %v813_v12 }
0x1062   :  { %v817_v15 = vrot.slane %v815_v13, 2  ;;  %v1035_v35 = vsel %vm1030_vm4, %v2998_v56, %v815_v13  ;;  %v1039_v56 = vld [vmem:[%s3196_s4 + $0x8] sm:$0xff] }
0x1063   :  { %v2109_v13 = vld [vmem:[#allocation7 + $0x1] ss:$0 sm:$0xff] }
0x1064   :  { %818 = vrot.lane.b32.xlu0 %v817_v15, %s2771_s21 }
0x10d6   :  { %v819_v17 = vpop.permute.xlu0 %818 }
0x10d7   :  { %2304 = vmatmul.mubr.msk.f32.vlgmr.msra.gmra.mrb[6].mxu1 %vm183_vm3, %v819_v17 }
0x11aa   :  { %v888_v18 = vpop.f32.mrb[6].mxu1 }
0x11ab   :  { %v893_v19 = vrot.slane %v888_v18, 4  ;;  %v2305_v20 = vpop.f32.mrb[7].mxu1 }
0x11ad   :  { %v895_v21 = vadd.f32 %v893_v19, %v2933_v14 }
0x11af   :  { %2595 = vtanh.f32 %v895_v21  ;;  %v2102_v23 = vmul.f32 -1.442695, %v895_v21 }
0x11b1   :  { %2597 = vpow2.f32 %v2102_v23 }
0x11b9   :  { %v2596_v22 = vpop.eup %2595 }
0x11ba   :  { %908 = vrot.lane.b32.xlu1 %v2596_v22, %s2778_s0 }
0x11bb   :  { %v2598_v24 = vpop.eup %2597 }
0x11bc   :  { %v899_v25 = vadd.f32 1.0, %v2598_v24 }
0x11be   :  { %2599 = vrcp.f32 %v899_v25 }
0x11c8   :  { %v2600_v26 = vpop.eup %2599 }
0x11c9   :  { %v906_v30 = vmul.f32 %v2600_v26, %v904_v29 }
0x122c   :  { %v909_v27 = vpop.permute.xlu1 %908 }
0x122d   :  { %v911_v28 = vmul.f32 %v2600_v26, %v909_v27 }
0x122f   :  { %913 = vrot.lane.b32.xlu0 %v911_v28, %s2771_s21 }
0x12a1   :  { %v914_v31 = vpop.permute.xlu0 %913 }
0x12a2   :  { %v916_v32 = vadd.f32 %v914_v31, %v906_v30 }
0x12a4   :  { %2601 = vtanh.f32 %v916_v32  ;;  %v1011_v51 = vrot.slane %v916_v32, 6 }
0x12ae   :  { %v2602_v33 = vpop.eup %2601 }
0x12af   :  { %919 = vrot.lane.b32.xlu1 %v2602_v33, %s2778_s0 }
0x1321   :  { %v920_v34 = vpop.permute.xlu1 %919 }
0x1322   :  { %v922_v16 = vmul.f32 %v2600_v26, %v920_v34 }
0x1324   :  { %v924_v36 = vrot.slane %v922_v16, 4  ;;  %v1036_v37 = vsel %vm104_vm1, %v1035_v35, %v922_v16 }
0x1326   :  { %925 = vrot.lane.b32.xlu0 %v924_v36, %s2771_s21 }
0x1398   :  { %v926_v39 = vpop.permute.xlu0 %925 }
0x1399   :  { %2315 = vmatmul.mubr.msk.f32.vlgmr.msra.gmra.mrb[8].mxu0 %vm183_vm3, %v926_v39 }
0x139a   :  { %2336 = vmatprep.mubr.msk.f32.mxu0 %vm2776_vm0, %v2777_v1  ;;  %2485 = vmatpush3.bf16.msra.mxu0 %v3050_v61 }
0x139b   :  { %2486 = vmatprep.subr.bf16.mxu0 %v2775_v0 }
0x139e   :  { %2488 = vmatpush3.bf16.msra.mxu0 %v3059_v2 }
0x139f   :  { %2495 = vmatprep.subr.bf16.mxu0 %v2775_v0 }
0x13a1   :  { %2337 = vmatmul.mubr.msk.f32.vlgmr.msra.gmra.mrb[10].mxu0 %vm183_vm3, %v1049_v4 }
0x13a2   :  { %2497 = vmatpush3.bf16.msra.mxu0 %v3050_v61  ;;  %2358 = vmatprep.mubr.msk.f32.mxu0 %vm2776_vm0, %v2777_v1 }
0x13a3   :  { %2498 = vmatprep.subr.bf16.mxu0 %v2775_v0 }
0x13a6   :  { %2500 = vmatpush3.bf16.msra.mxu0 %v3059_v2 }
0x13a7   :  { %2507 = vmatprep.subr.bf16.mxu0 %v2775_v0 }
0x146c   :  { %v995_v40 = vpop.f32.mrb[8].mxu0 }
0x146d   :  { %v1000_v41 = vrot.slane %v995_v40, 2  ;;  %v2316_v42 = vpop.f32.mrb[9].mxu0 }
0x146f   :  { %v1002_v43 = vadd.f32 %v1000_v41, %v2933_v14 }
0x1471   :  { %2603 = vtanh.f32 %v1002_v43  ;;  %v2104_v45 = vmul.f32 -1.442695, %v1002_v43 }
0x1473   :  { %2605 = vpow2.f32 %v2104_v45 }
0x1474   :  { %v1210_v11 = vpop.f32.mrb[10].mxu0 }
0x1475   :  { %v2338_v12 = vpop.f32.mrb[11].mxu0 }
0x147b   :  { %v2604_v44 = vpop.eup %2603 }
0x147c   :  { %1015 = vrot.lane.b32.xlu1 %v2604_v44, %s2778_s0 }
0x147d   :  { %v2606_v46 = vpop.eup %2605 }
0x147e   :  { %v1006_v47 = vadd.f32 1.0, %v2606_v46 }
0x1480   :  { %2607 = vrcp.f32 %v1006_v47 }
0x148a   :  { %v2608_v48 = vpop.eup %2607 }
0x148b   :  { %v1013_v52 = vmul.f32 %v2608_v48, %v1011_v51 }
0x14ee   :  { %v1016_v49 = vpop.permute.xlu1 %1015 }
0x14ef   :  { %v1018_v50 = vmul.f32 %v2608_v48, %v1016_v49 }
0x14f1   :  { %1020 = vrot.lane.b32.xlu0 %v1018_v50, %s2771_s21 }
0x14f5   :  { %1058 = vrot.lane.b32.xlu0 %v2985_v38, %s2771_s21  ;;  %v2475_v38 = vpack.c.bf16 %v1039_v56, %v1038_v55 }
0x14f7   :  { %2476 = vmatprep.subr.bf16.mxu1 %v2475_v38 }
0x14f8   :  { %2478 = vmatpush3.bf16.msra.mxu1 %v2475_v38 }
0x14f9   :  { %2480 = vmatprep.subr.bf16.mxu1 %v2479_v62 }
0x14fc   :  { %2482 = vmatpush3.bf16.msra.mxu1 %v2479_v62 }
0x14fd   :  { %2489 = vmatprep.subr.bf16.mxu1 %v2775_v0 }
0x1563   :  { %v1021_v14 = vpop.permute.xlu0 %1020 }
0x1564   :  { %v1023_v53 = vadd.f32 %v1021_v14, %v1013_v52 }
0x1566   :  { %2609 = vtanh.f32 %v1023_v53 }
0x1567   :  { %v1059_v54 = vpop.permute.xlu0 %1058 }
0x1568   :  { %2325 = vmatprep.mubr.msk.f32.mxu1 %vm183_vm3, %v1059_v54 }
0x1570   :  { %v2610_v3 = vpop.eup %2609 }
0x1571   :  { %1026 = vrot.lane.b32.xlu1 %v2610_v3, %s2778_s0 }
0x15e3   :  { %v1027_v6 = vpop.permute.xlu1 %1026 }
0x15e4   :  { %v1029_v10 = vmul.f32 %v2608_v48, %v1027_v6 }
0x15e6   :  { %v1037_v7 = vsel %vm1033_vm5, %v1036_v37, %v1029_v10 }
0x15e7   :  { %1060 = vrot.lane.b32.xlu1 %v1037_v7, %s2771_s21 }
0x15eb   :  { %1223 = vrot.lane.b32.xlu1 %v1051_v8, %s2771_s21 }
0x1659   :  { %v1061_v9 = vpop.permute.xlu1 %1060 }
0x165a   :  { %2326 = vmatmul.mubr.msk.f32.vlgmr.msra.gmra.mrb[8].mxu1 %vm183_vm3, %v1061_v9 }
0x165b   :  { %2491 = vmatpush3.bf16.msra.mxu1 %v3050_v61  ;;  %2347 = vmatprep.mubr.msk.f32.mxu1 %vm2776_vm0, %v2777_v1 }
0x165c   :  { %2492 = vmatprep.subr.bf16.mxu1 %v2775_v0 }
0x165d   :  { %v1224_v28 = vpop.permute.xlu1 %1223 }
0x165f   :  { %2494 = vmatpush3.bf16.msra.mxu1 %v3059_v2 }
0x1660   :  { %2501 = vmatprep.subr.bf16.mxu1 %v2775_v0 }
0x172d   :  { %v2327_v15 = vpop.f32.mrb[8].mxu1 }
0x172e   :  { %v3083_v17 = vadd.f32 %v2327_v15, %v2109_v13  ;;  %v1132_v18 = vpop.f32.mrb[9].mxu1 }
0x172f   :  { %v3085_v19 = vadd.f32 %v2109_v13, %v1132_v18 }
0x1731   :  { %v1214_v20 = vadd.f32 %v1210_v11, %v3085_v19 }
0x1733   :  { %2611 = vtanh.f32 %v1214_v20  ;;  %v2113_v22 = vmul.f32 -1.442695, %v1214_v20 }
0x1735   :  { %2613 = vpow2.f32 %v2113_v22 }
0x173d   :  { %v2612_v21 = vpop.eup %2611 }
0x173e   :  { %1228 = vrot.lane.b32.xlu0 %v2612_v21, %s2778_s0 }
0x173f   :  { %v2614_v23 = vpop.eup %2613 }
0x1740   :  { %v1218_v24 = vadd.f32 1.0, %v2614_v23 }
0x1742   :  { %2615 = vrcp.f32 %v1218_v24 }
0x174c   :  { %v2616_v25 = vpop.eup %2615 }
0x174d   :  { %v1226_v29 = vmul.f32 %v2616_v25, %v1224_v28 }
0x17b0   :  { %v1229_v26 = vpop.permute.xlu0 %1228 }
0x17b1   :  { %v1231_v27 = vmul.f32 %v2616_v25, %v1229_v26 }
0x17b3   :  { %1233 = vrot.lane.b32.xlu0 %v1231_v27, %s2771_s21 }
0x1825   :  { %v1234_v30 = vpop.permute.xlu0 %1233 }
0x1826   :  { %v1236_v31 = vadd.f32 %v1234_v30, %v1226_v29 }
0x1828   :  { %2617 = vtanh.f32 %v1236_v31  ;;  %v1330_v47 = vrot.slane %v1236_v31, 6 }
0x1832   :  { %v2618_v32 = vpop.eup %2617 }
0x1833   :  { %1239 = vrot.lane.b32.xlu1 %v2618_v32, %s2778_s0 }
0x18a5   :  { %v1240_v33 = vpop.permute.xlu1 %1239 }
0x18a6   :  { %v1242_v34 = vmul.f32 %v2616_v25, %v1240_v33 }
0x18a8   :  { %1244 = vrot.lane.b32.xlu0 %v1242_v34, %s2771_s21 }
0x191a   :  { %v1245_v16 = vpop.permute.xlu0 %1244 }
0x191b   :  { %2348 = vmatmul.mubr.msk.f32.vlgmr.msra.gmra.mrb[10].mxu1 %vm183_vm3, %v1245_v16 }
0x191c   :  { %2503 = vmatpush3.bf16.msra.mxu1 %v3050_v61  ;;  %2369 = vmatprep.mubr.msk.f32.mxu1 %vm2776_vm0, %v2777_v1 }
0x191d   :  { %2504 = vmatprep.subr.bf16.mxu1 %v2775_v0 }
0x1920   :  { %2506 = vmatpush3.bf16.msra.mxu1 %v3059_v2 }
0x1921   :  { %2513 = vmatprep.subr.bf16.mxu1 %v2775_v0 }
0x19ee   :  { %v1314_v35 = vpop.f32.mrb[10].mxu1 }
0x19ef   :  { %v1319_v36 = vrot.slane %v1314_v35, 6  ;;  %v2349_v37 = vpop.f32.mrb[11].mxu1 }
0x19f1   :  { %v1321_v39 = vadd.f32 %v1319_v36, %v3085_v19 }
0x19f3   :  { %2619 = vtanh.f32 %v1321_v39  ;;  %v2115_v41 = vmul.f32 -1.442695, %v1321_v39 }
0x19f5   :  { %2621 = vpow2.f32 %v2115_v41 }
0x19fd   :  { %v2620_v40 = vpop.eup %2619 }
0x19fe   :  { %1334 = vrot.lane.b32.xlu1 %v2620_v40, %s2778_s0 }
0x19ff   :  { %v2622_v42 = vpop.eup %2621 }
0x1a00   :  { %v1325_v43 = vadd.f32 1.0, %v2622_v42 }
0x1a02   :  { %2623 = vrcp.f32 %v1325_v43 }
0x1a0c   :  { %v2624_v44 = vpop.eup %2623 }
0x1a0d   :  { %v1332_v48 = vmul.f32 %v2624_v44, %v1330_v47 }
0x1a70   :  { %v1335_v45 = vpop.permute.xlu1 %1334 }
0x1a71   :  { %v1337_v46 = vmul.f32 %v2624_v44, %v1335_v45 }
0x1a73   :  { %1339 = vrot.lane.b32.xlu0 %v1337_v46, %s2771_s21 }
0x1ae5   :  { %v1340_v49 = vpop.permute.xlu0 %1339 }
0x1ae6   :  { %v1342_v50 = vadd.f32 %v1340_v49, %v1332_v48 }
0x1ae8   :  { %2625 = vtanh.f32 %v1342_v50  ;;  %v1437_v4 = vrot.slane %v1342_v50, 6 }
0x1af2   :  { %v2626_v51 = vpop.eup %2625 }
0x1af3   :  { %1345 = vrot.lane.b32.xlu1 %v2626_v51, %s2778_s0 }
0x1b65   :  { %v1346_v52 = vpop.permute.xlu1 %1345 }
0x1b66   :  { %v1348_v14 = vmul.f32 %v2624_v44, %v1346_v52 }
0x1b68   :  { %v1350_v53 = vrot.slane %v1348_v14, 2 }
0x1b6a   :  { %1351 = vrot.lane.b32.xlu0 %v1350_v53, %s2771_s21 }
0x1bdc   :  { %v1352_v54 = vpop.permute.xlu0 %1351 }
0x1bdd   :  { %2359 = vmatmul.mubr.msk.f32.vlgmr.msra.gmra.mrb[12].mxu0 %vm183_vm3, %v1352_v54 }
0x1bde   :  { %2509 = vmatpush3.bf16.msra.mxu0 %v3050_v61  ;;  %2380 = vmatprep.mubr.msk.f32.mxu0 %vm2776_vm0, %v2777_v1 }
0x1bdf   :  { %2510 = vmatprep.subr.bf16.mxu0 %v2775_v0 }
0x1be2   :  { %2512 = vmatpush3.bf16.msra.mxu0 %v3059_v2 }
0x1be3   :  { %2519 = vmatprep.subr.bf16.mxu0 %v2775_v0 }
0x1cb0   :  { %v1421_v55 = vpop.f32.mrb[12].mxu0 }
0x1cb1   :  { %v1426_v56 = vrot.slane %v1421_v55, 4  ;;  %v2360_v57 = vpop.f32.mrb[13].mxu0 }
0x1cb3   :  { %v1428_v38 = vadd.f32 %v1426_v56, %v3085_v19 }
0x1cb5   :  { %2627 = vtanh.f32 %v1428_v38  ;;  %v2117_v59 = vmul.f32 -1.442695, %v1428_v38 }
0x1cb7   :  { %2629 = vpow2.f32 %v2117_v59 }
0x1cbf   :  { %v2628_v58 = vpop.eup %2627 }
0x1cc0   :  { %1441 = vrot.lane.b32.xlu1 %v2628_v58, %s2778_s0 }
0x1cc1   :  { %v2630_v60 = vpop.eup %2629 }
0x1cc2   :  { %v1432_v62 = vadd.f32 1.0, %v2630_v60 }
0x1cc4   :  { %2631 = vrcp.f32 %v1432_v62 }
0x1cce   :  { %v2632_v63 = vpop.eup %2631 }
0x1ccf   :  { %v1439_v6 = vmul.f32 %v2632_v63, %v1437_v4 }
0x1d32   :  { %v1442_v5 = vpop.permute.xlu1 %1441 }
0x1d33   :  { %v1444_v3 = vmul.f32 %v2632_v63, %v1442_v5 }
0x1d35   :  { %1446 = vrot.lane.b32.xlu0 %v1444_v3, %s2771_s21 }
0x1da7   :  { %v1447_v10 = vpop.permute.xlu0 %1446 }
0x1da8   :  { %v1449_v7 = vadd.f32 %v1447_v10, %v1439_v6 }
0x1daa   :  { %2633 = vtanh.f32 %v1449_v7  ;;  %v1544_v29 = vrot.slane %v1449_v7, 6 }
0x1db4   :  { %v2634_v8 = vpop.eup %2633 }
0x1db5   :  { %1452 = vrot.lane.b32.xlu1 %v2634_v8, %s2778_s0 }
0x1e27   :  { %v1453_v9 = vpop.permute.xlu1 %1452 }
0x1e28   :  { %v1455_v11 = vmul.f32 %v2632_v63, %v1453_v9 }
0x1e2a   :  { %v1457_v12 = vrot.slane %v1455_v11, 4 }
0x1e2c   :  { %1458 = vrot.lane.b32.xlu0 %v1457_v12, %s2771_s21 }
0x1e9e   :  { %v1459_v13 = vpop.permute.xlu0 %1458 }
0x1e9f   :  { %2370 = vmatmul.mubr.msk.f32.vlgmr.msra.gmra.mrb[12].mxu1 %vm183_vm3, %v1459_v13 }
0x1ea0   :  { %2515 = vmatpush3.bf16.msra.mxu1 %v3050_v61  ;;  %2391 = vmatprep.mubr.msk.f32.mxu1 %vm2776_vm0, %v2777_v1 }
0x1ea1   :  { %2516 = vmatprep.subr.bf16.mxu1 %v2775_v0 }
0x1ea4   :  { %2518 = vmatpush3.bf16.msra.mxu1 %v3059_v2 }
0x1ea5   :  { %2525 = vmatprep.subr.bf16.mxu1 %v2775_v0 }
0x1f72   :  { %v1528_v15 = vpop.f32.mrb[12].mxu1 }
0x1f73   :  { %v1533_v18 = vrot.slane %v1528_v15, 2  ;;  %v2371_v20 = vpop.f32.mrb[13].mxu1 }
0x1f75   :  { %v1535_v21 = vadd.f32 %v1533_v18, %v3085_v19 }
0x1f77   :  { %2635 = vtanh.f32 %v1535_v21  ;;  %v2119_v23 = vmul.f32 -1.442695, %v1535_v21 }
0x1f79   :  { %2637 = vpow2.f32 %v2119_v23 }
0x1f81   :  { %v2636_v22 = vpop.eup %2635 }
0x1f82   :  { %1548 = vrot.lane.b32.xlu1 %v2636_v22, %s2778_s0 }
0x1f83   :  { %v2638_v24 = vpop.eup %2637 }
0x1f84   :  { %v1539_v25 = vadd.f32 1.0, %v2638_v24 }
0x1f86   :  { %2639 = vrcp.f32 %v1539_v25 }
0x1f90   :  { %v2640_v26 = vpop.eup %2639 }
0x1f91   :  { %v1546_v30 = vmul.f32 %v2640_v26, %v1544_v29 }
0x1ff4   :  { %v1549_v27 = vpop.permute.xlu1 %1548 }
0x1ff5   :  { %v1551_v28 = vmul.f32 %v2640_v26, %v1549_v27 }
0x1ff7   :  { %1553 = vrot.lane.b32.xlu0 %v1551_v28, %s2771_s21 }
0x2069   :  { %v1554_v31 = vpop.permute.xlu0 %1553 }
0x206a   :  { %v1556_v32 = vadd.f32 %v1554_v31, %v1546_v30 }
0x206c   :  { %2641 = vtanh.f32 %v1556_v32  ;;  %v1648_v47 = vrot.slane %v1556_v32, 6 }
0x2076   :  { %v2642_v19 = vpop.eup %2641 }
0x2077   :  { %1559 = vrot.lane.b32.xlu1 %v2642_v19, %s2778_s0 }
0x20e9   :  { %v1560_v33 = vpop.permute.xlu1 %1559 }
0x20ea   :  { %v1562_v34 = vmul.f32 %v2640_v26, %v1560_v33 }
0x20ec   :  { %v1564_v16 = vrot.slane %v1562_v34, 6 }
0x20ee   :  { %1565 = vrot.lane.b32.xlu0 %v1564_v16, %s2771_s21 }
0x2160   :  { %v1566_v35 = vpop.permute.xlu0 %1565 }
0x2161   :  { %2381 = vmatmul.mubr.msk.f32.vlgmr.msra.gmra.mrb[14].mxu0 %vm183_vm3, %v1566_v35 }
0x2162   :  { %2521 = vmatpush3.bf16.msra.mxu0 %v3050_v61  ;;  %2402 = vmatprep.mubr.msk.f32.mxu0 %vm2776_vm0, %v2777_v1 }
0x2163   :  { %2522 = vmatprep.subr.bf16.mxu0 %v2775_v0 }
0x2166   :  { %2524 = vmatpush3.bf16.msra.mxu0 %v3059_v2 }
0x2167   :  { %2531 = vmatprep.subr.bf16.mxu0 %v2775_v0 }
0x2234   :  { %v1635_v36 = vpop.f32.mrb[14].mxu0 }
0x2235   :  { %v1639_v37 = vadd.f32 %v1635_v36, %v3083_v17  ;;  %v2382_v39 = vpop.f32.mrb[15].mxu0 }
0x2237   :  { %2643 = vtanh.f32 %v1639_v37  ;;  %v2121_v41 = vmul.f32 -1.442695, %v1639_v37 }
0x2239   :  { %2645 = vpow2.f32 %v2121_v41 }
0x2241   :  { %v2644_v40 = vpop.eup %2643 }
0x2242   :  { %1652 = vrot.lane.b32.xlu1 %v2644_v40, %s2778_s0 }
0x2243   :  { %v2646_v42 = vpop.eup %2645 }
0x2244   :  { %v1643_v43 = vadd.f32 1.0, %v2646_v42 }
0x2246   :  { %2647 = vrcp.f32 %v1643_v43 }
0x2250   :  { %v2648_v44 = vpop.eup %2647 }
0x2251   :  { %v1650_v48 = vmul.f32 %v2648_v44, %v1648_v47 }
0x22b4   :  { %v1653_v45 = vpop.permute.xlu1 %1652 }
0x22b5   :  { %v1655_v46 = vmul.f32 %v2648_v44, %v1653_v45 }
0x22b7   :  { %1657 = vrot.lane.b32.xlu0 %v1655_v46, %s2771_s21 }
0x2329   :  { %v1658_v49 = vpop.permute.xlu0 %1657 }
0x232a   :  { %v1660_v50 = vadd.f32 %v1658_v49, %v1650_v48 }
0x232c   :  { %2649 = vtanh.f32 %v1660_v50 }
0x2336   :  { %v2650_v51 = vpop.eup %2649 }
0x2337   :  { %1663 = vrot.lane.b32.xlu1 %v2650_v51, %s2778_s0  ;;  %v1992_v51 = vld [vmem:[%s3199_s7 + $0x10] sm:$0xff] }
0x23a9   :  { %v1664_v52 = vpop.permute.xlu1 %1663 }
0x23aa   :  { %v3139_v14 = vmul.f32 %v2648_v44, %v1664_v52 }
0x23ac   :  { %1668 = vrot.lane.b32.xlu0 %v3139_v14, %s2771_s21 }
0x241e   :  { %v1669_v53 = vpop.permute.xlu0 %1668 }
0x241f   :  { %2392 = vmatmul.mubr.msk.f32.vlgmr.msra.gmra.mrb[14].mxu1 %vm183_vm3, %v1669_v53 }
0x2420   :  { %2527 = vmatpush3.bf16.msra.mxu1 %v3050_v61  ;;  %2413 = vmatprep.mubr.msk.f32.mxu1 %vm2776_vm0, %v2777_v1 }
0x2421   :  { %2528 = vmatprep.subr.bf16.mxu1 %v2775_v0 }
0x2424   :  { %2530 = vmatpush3.bf16.msra.mxu1 %v3059_v2  ;;  %v1754_v2 = vrot.slane %v1660_v50, 6  ;;  %v1991_v50 = vld [vmem:[%s3199_s7 + $0x8] sm:$0xff] }
0x24f2   :  { %v1738_v54 = vpop.f32.mrb[14].mxu1 }
0x24f3   :  { %v1743_v55 = vrot.slane %v1738_v54, 6  ;;  %v2393_v56 = vpop.f32.mrb[15].mxu1 }
0x24f5   :  { %v1745_v57 = vadd.f32 %v1743_v55, %v3083_v17 }
0x24f7   :  { %2651 = vtanh.f32 %v1745_v57  ;;  %v2123_v58 = vmul.f32 -1.442695, %v1745_v57 }
0x24f9   :  { %2653 = vpow2.f32 %v2123_v58  ;;  %v2128_v58 = vld [vmem:[%s3200_s8] ss:$0 sm:$0xff] }
0x2501   :  { %v2652_v38 = vpop.eup %2651 }
0x2502   :  { %1758 = vrot.lane.b32.xlu1 %v2652_v38, %s2778_s0 }
0x2503   :  { %v2654_v59 = vpop.eup %2653 }
0x2504   :  { %v1749_v61 = vadd.f32 1.0, %v2654_v59 }
0x2506   :  { %2655 = vrcp.f32 %v1749_v61 }
0x2510   :  { %v2656_v60 = vpop.eup %2655 }
0x2511   :  { %v1756_v5 = vmul.f32 %v2656_v60, %v1754_v2 }
0x2574   :  { %v1759_v62 = vpop.permute.xlu1 %1758 }
0x2575   :  { %v1761_v63 = vmul.f32 %v2656_v60, %v1759_v62 }
0x2577   :  { %1763 = vrot.lane.b32.xlu0 %v1761_v63, %s2771_s21 }
0x25e9   :  { %v1764_v3 = vpop.permute.xlu0 %1763 }
0x25ea   :  { %v1766_v4 = vadd.f32 %v1764_v3, %v1756_v5 }
0x25ec   :  { %2657 = vtanh.f32 %v1766_v4 }
0x25f6   :  { %v2658_v6 = vpop.eup %2657 }
0x25f7   :  { %1769 = vrot.lane.b32.xlu1 %v2658_v6, %s2778_s0 }
0x2669   :  { %v1770_v10 = vpop.permute.xlu1 %1769 }
0x266a   :  { %v1772_v7 = vmul.f32 %v2656_v60, %v1770_v10 }
0x266c   :  { %v1774_v8 = vrot.slane %v1772_v7, 2  ;;  %v1987_v32 = vsel %vm1030_vm4, %v3139_v14, %v1772_v7  ;;  %v1993_v14 = vld [vmem:[%s3199_s7 + $0x18] sm:$0xff] }
0x266d   :  { %v2535_v53 = vpack.c.bf16 %v1993_v14, %v1992_v51 }
0x266e   :  { %1775 = vrot.lane.b32.xlu0 %v1774_v8, %s2771_s21 }
0x26e0   :  { %v1776_v9 = vpop.permute.xlu0 %1775 }
0x26e1   :  { %2403 = vmatmul.mubr.msk.f32.vlgmr.msra.gmra.mrb[16].mxu0 %vm183_vm3, %v1776_v9 }
0x26e2   :  { %2424 = vmatprep.mubr.msk.f32.mxu0 %vm2776_vm0, %v2777_v1  ;;  %v1861_v1 = vrot.slane %v1766_v4, 6 }
0x27b4   :  { %v1845_v11 = vpop.f32.mrb[16].mxu0 }
0x27b5   :  { %v1850_v12 = vrot.slane %v1845_v11, 4  ;;  %v2404_v13 = vpop.f32.mrb[17].mxu0 }
0x27b7   :  { %v1852_v15 = vadd.f32 %v1850_v12, %v3083_v17 }
0x27b9   :  { %2659 = vtanh.f32 %v1852_v15  ;;  %v2125_v20 = vmul.f32 -1.442695, %v1852_v15 }
0x27bb   :  { %2661 = vpow2.f32 %v2125_v20 }
0x27c3   :  { %v2660_v18 = vpop.eup %2659 }
0x27c4   :  { %1865 = vrot.lane.b32.xlu1 %v2660_v18, %s2778_s0 }
0x27c5   :  { %v2662_v21 = vpop.eup %2661 }
0x27c6   :  { %v1856_v22 = vadd.f32 1.0, %v2662_v21 }
0x27c8   :  { %2663 = vrcp.f32 %v1856_v22 }
0x27d2   :  { %v2664_v23 = vpop.eup %2663 }
0x27d3   :  { %v1863_v26 = vmul.f32 %v2664_v23, %v1861_v1 }
0x2836   :  { %v1866_v24 = vpop.permute.xlu1 %1865 }
0x2837   :  { %v1868_v25 = vmul.f32 %v2664_v23, %v1866_v24 }
0x2839   :  { %1870 = vrot.lane.b32.xlu0 %v1868_v25, %s2771_s21 }
0x28ab   :  { %v1871_v27 = vpop.permute.xlu0 %1870 }
0x28ac   :  { %v1873_v28 = vadd.f32 %v1871_v27, %v1863_v26 }
0x28ae   :  { %2665 = vtanh.f32 %v1873_v28  ;;  %v1968_v46 = vrot.slane %v1873_v28, 6 }
0x28b8   :  { %v2666_v29 = vpop.eup %2665 }
0x28b9   :  { %1876 = vrot.lane.b32.xlu1 %v2666_v29, %s2778_s0 }
0x292b   :  { %v1877_v30 = vpop.permute.xlu1 %1876 }
0x292c   :  { %v1879_v31 = vmul.f32 %v2664_v23, %v1877_v30 }
0x292e   :  { %v1881_v19 = vrot.slane %v1879_v31, 4  ;;  %v1988_v33 = vsel %vm104_vm1, %v1987_v32, %v1879_v31 }
0x2930   :  { %1882 = vrot.lane.b32.xlu0 %v1881_v19, %s2771_s21 }
0x29a2   :  { %v1883_v34 = vpop.permute.xlu0 %1882 }
0x29a3   :  { %2414 = vmatmul.mubr.msk.f32.vlgmr.msra.gmra.mrb[16].mxu1 %vm183_vm3, %v1883_v34 }
0x2a76   :  { %v1952_v16 = vpop.f32.mrb[16].mxu1 }
0x2a77   :  { %v1957_v35 = vrot.slane %v1952_v16, 2  ;;  %v2415_v36 = vpop.f32.mrb[17].mxu1 }
0x2a79   :  { %v1959_v37 = vadd.f32 %v1957_v35, %v3083_v17  ;;  %v1990_v17 = vld [vmem:[%s3199_s7] sm:$0xff] }
0x2a7a   :  { %v2532_v52 = vpack.c.bf16 %v1991_v50, %v1990_v17 }
0x2a7b   :  { %2667 = vtanh.f32 %v1959_v37  ;;  %v2127_v40 = vmul.f32 -1.442695, %v1959_v37 }
0x2a7c   :  { %2533 = vmatpush3.bf16.msra.mxu0 %v2532_v52 }
0x2a7d   :  { %2669 = vpow2.f32 %v2127_v40  ;;  %2534 = vmatprep.subr.bf16.mxu0 %v2775_v0 }
0x2a80   :  { %2536 = vmatpush3.bf16.msra.mxu0 %v2535_v53 }
0x2a85   :  { %v2668_v39 = vpop.eup %2667 }
0x2a86   :  { %1972 = vrot.lane.b32.xlu1 %v2668_v39, %s2778_s0 }
0x2a87   :  { %v2670_v41 = vpop.eup %2669 }
0x2a88   :  { %v1963_v42 = vadd.f32 1.0, %v2670_v41 }
0x2a8a   :  { %2671 = vrcp.f32 %v1963_v42 }
0x2a94   :  { %v2672_v43 = vpop.eup %2671 }
0x2a95   :  { %v1970_v47 = vmul.f32 %v2672_v43, %v1968_v46 }
0x2af8   :  { %v1973_v44 = vpop.permute.xlu1 %1972 }
0x2af9   :  { %v1975_v45 = vmul.f32 %v2672_v43, %v1973_v44 }
0x2afb   :  { %1977 = vrot.lane.b32.xlu0 %v1975_v45, %s2771_s21 }
0x2b6d   :  { %v1978_v48 = vpop.permute.xlu0 %1977 }
0x2b6e   :  { %v1980_v49 = vadd.f32 %v1978_v48, %v1970_v47 }
0x2b70   :  { %2673 = vtanh.f32 %v1980_v49 }
0x2b7a   :  { %v2674_v54 = vpop.eup %2673 }
0x2b7b   :  { %1983 = vrot.lane.b32.xlu1 %v2674_v54, %s2778_s0 }
0x2bed   :  { %v1984_v55 = vpop.permute.xlu1 %1983 }
0x2bee   :  { %v1986_v56 = vmul.f32 %v2672_v43, %v1984_v55 }
0x2bf0   :  { %v1989_v57 = vsel %vm1033_vm5, %v1988_v33, %v1986_v56 }
0x2bf1   :  { %2002 = vrot.lane.b32.xlu0 %v1989_v57, %s2771_s21 }
0x2c63   :  { %v2003_v38 = vpop.permute.xlu0 %2002 }
0x2c64   :  { %2425 = vmatmul.mubr.msk.f32.vlgmr.msra.gmra.mrb[18].mxu0 %vm183_vm3, %v2003_v38 }
0x2d37   :  { %v2072_v59 = vpop.f32.mrb[18].mxu0 }
0x2d38   :  { %v2073_v0 = vadd.f32 %v2128_v58, %v2072_v59  ;;  %v2426_v61 = vpop.f32.mrb[19].mxu0 }
0x2d3a   :  { %2077 = vst.msk [vmem:[%s3201_s9] sm:$0xff] %vm2076_vm6, %v2073_v0 }
0x2d3b   :  { %2082 = vsyncpa [#allocation3], 1 }
0x2d3c   :  { %2083 = vsyncpa [#allocation5], 1 }
0x2d3d   :  { %2084 = vsyncpa [#allocation8], 1 }

</bundles_post_ra>
